<compile_context>
chip_gen: v5e
topology: v5e:2x2
jax: 0.10.0
libtpu: 0.0.40
codegen_flags: <defaults>
</compile_context>

<pallas_src>
import numpy as np
import jax
import jax.numpy as jnp
from jax.experimental import pallas as pl
from jax.experimental.pallas import tpu as pltpu

# ------------------------- configuration (small demo shapes) -----------------
NODE_NUM = 16          # nodes per graph              (orig: 90)
NODE_LEN = 32          # feature dim / node_input_dim (orig: 115)
RETAIN_NODE = 4        # nodes kept by TopK pooling   (orig: 10)
BATCH_SIZE = 4         # graphs per batch             (orig: 10)
RANG = 3               # temporal windows in edge_attr
TENDENCY = 0.1         # belongs to Category_TopK_Pooling internals (unused)
EPS_BN = 1e-5


def _full_spec(shape):
    nd = len(shape)
    return pl.BlockSpec(shape, lambda i, _nd=nd: (0,) * _nd)


# ----------------- single fused kernel: conv/BN x2 + TopK + head -------------
def _fused_kernel(a_ref, x_ref, w1_ref, b1_ref, w2_ref, b2_ref, pn_ref,
                  wh_ref, bh_ref, out_ref, idx_ref):
    B, N, K = BATCH_SIZE, NODE_NUM, RETAIN_NODE
    F = x_ref.shape[-1]

    a = a_ref[...]                                 # (B*N, B*N) block-diag adj
    inv_rows = 1.0 / (B * N)

    def gcn_bn(h, w, b):
        # TemporalConv (GCN-style message passing): H <- (A H) W + b,
        # done as one block-diagonal MXU matmul (no batched einsum, no reshape).
        ah = jnp.dot(a, h, preferred_element_type=jnp.float32)
        hw = jnp.dot(ah, w, preferred_element_type=jnp.float32) + b
        # nn.BatchNorm1d(node_len): fresh layer each forward -> identity affine,
        # training mode -> batch statistics. One-pass moments: var = E[x^2]-mu^2.
        mu = jnp.sum(hw, axis=0, keepdims=True) * inv_rows
        ex2 = jnp.sum(hw * hw, axis=0, keepdims=True) * inv_rows
        var = jnp.maximum(ex2 - mu * mu, 0.0)
        return (hw - mu) * jax.lax.rsqrt(var + EPS_BN)

    h = gcn_bn(x_ref[...], w1_ref[...], b1_ref[...])
    h = gcn_bn(h, w2_ref[...], b2_ref[...])               # (B*N, F)

    # TopK pooling scores: s = H p / ||p||  (pn pre-normalized in glue).
    h_bnf = h.reshape(B, N, F)                            # split sublane axis
    scores = jnp.sum(h_bnf * pn_ref[...], axis=-1)        # (B, N)

    # Per-graph top-K via K-step unrolled argmax + mask (N on lanes; VPU/XLU).
    col = jax.lax.broadcasted_iota(jnp.int32, (B, N), 1)
    kcol = jax.lax.broadcasted_iota(jnp.int32, (B, K), 1)
    cur = scores
    mask = jnp.zeros((B, N), jnp.float32)
    idx = jnp.zeros((B, K), jnp.int32)
    for k in range(K):                                    # static unroll, K=4
        mx = jnp.max(cur, axis=-1, keepdims=True)                     # (B, 1)
        sel = jnp.min(jnp.where(cur == mx, col, N), axis=-1,
                      keepdims=True)                                  # (B, 1)
        hit = col == sel                                              # (B, N)
        mask = mask + hit.astype(jnp.float32)
        idx = jnp.where(kcol == k, sel, idx)
        cur = jnp.where(hit, -jnp.inf, cur)
    idx_ref[...] = idx                                    # (B, K) local node ids

    # tanh gate on selected nodes, then mean over the K retained nodes.
    gate = mask * jnp.tanh(scores)                        # (B, N)
    m = jnp.sum(h_bnf * gate[:, :, None], axis=1) * (1.0 / K)         # (B, F)

    # Head: sigmoid -> lin -> classifier (fused: no nonlinearity between) -> sigmoid.
    s = jax.nn.sigmoid(m)
    o = jnp.sum(s * wh_ref[...], axis=-1, keepdims=True) + bh_ref[...]
    out_ref[...] = jax.nn.sigmoid(o)                      # (B, 1)


def bcgcn_fused(a_bd, x_flat, w1, b1, w2, b2, pn, wh, bh):
    B, K = BATCH_SIZE, RETAIN_NODE
    # TODO(synk): with larger batches on v7x, split the graph axis over a
    # "parallel" grid dimension so both TensorCores get work; grid=(1,) here.
    return pl.pallas_call(
        _fused_kernel,
        grid=(1,),
        in_specs=[_full_spec(a_bd.shape), _full_spec(x_flat.shape),
                  _full_spec(w1.shape), _full_spec(b1.shape),
                  _full_spec(w2.shape), _full_spec(b2.shape),
                  _full_spec(pn.shape), _full_spec(wh.shape),
                  _full_spec(bh.shape)],
        out_specs=(_full_spec((B, 1)), _full_spec((B, K))),
        out_shape=(jax.ShapeDtypeStruct((B, 1), jnp.float32),
                   jax.ShapeDtypeStruct((B, K), jnp.int32)),
        compiler_params=pltpu.CompilerParams(
            dimension_semantics=("arbitrary",)),
    )(a_bd, x_flat, w1, b1, w2, b2, pn, wh, bh)


# ------------------------- full forward (module equivalent) ------------------
def temporal_bcgcn_forward(params, x, edge_index, edge_attr, batch):
    B, N, F, K = BATCH_SIZE, NODE_NUM, NODE_LEN, RETAIN_NODE
    # Edge list is the fixed canonical order produced by Dataset.process
    # (all ordered pairs (src, dst), src-major, dst increasing, diag skipped),
    # so the adjacency is built by pure reshape/pad — no scatter needed.
    del edge_index, batch

    x_flat = x.reshape(B * N, F).astype(jnp.float32)

    # --- dense adjacency by reshape+pad (zero diagonal insertion trick) ------
    # TODO(synk): edge weights averaged over the RANG temporal windows
    # (per-window use inside TemporalConv is not available).
    w_e = jnp.mean(edge_attr.astype(jnp.float32), axis=1)        # (B*N*(N-1),)
    w_g = w_e.reshape(B, N * (N - 1))
    m1 = jnp.pad(w_g.reshape(B, N - 1, N), ((0, 0), (0, 0), (0, 1)))
    flat = jnp.pad(m1.reshape(B, (N - 1) * (N + 1)), ((0, 0), (1, 0)))
    M = flat.reshape(B, N, N)                                    # M[b, src, dst]
    A = jnp.swapaxes(M, 1, 2)                                    # A[b, dst, src]
    # block-diagonal (B*N, B*N) adjacency for a single matmul per GCN layer
    a_bd = (jnp.eye(B, dtype=jnp.float32)[:, :, None, None] * A[:, None, :, :]
            ).transpose(0, 2, 1, 3).reshape(B * N, B * N)

    # --- parameter-only folding (kept out of the kernel) ---------------------
    p = params['p']
    pn = p * jax.lax.rsqrt(jnp.sum(p * p, axis=1, keepdims=True) + 1e-12)
    # lin -> classifier have no nonlinearity between them in the torch model,
    # so fold them into a single (1, F) vector + scalar bias (exact).
    wh = jnp.dot(params['w_lin'], params['w_cls']).T                  # (1, F)
    bh = jnp.dot(params['b_lin'], params['w_cls']) + params['b_cls']  # (1, 1)

    out, idx = bcgcn_fused(a_bd, x_flat, params['w1'], params['b1'],
                           params['w2'], params['b2'], pn, wh, bh)

    # perm: global (flat B*N) indices of retained nodes, score-descending.
    perm = (idx + jnp.arange(B, dtype=idx.dtype)[:, None] * N).reshape(-1)
    return out.reshape(-1), perm                                 # (B,), (B*K,)


# ------------------------- deterministic parameter init ----------------------
def init_params(key):
    F = NODE_LEN
    H = 2 * F + 1                       # Linear(node_len, 2*node_len + 1)
    ks = jax.random.split(key, 7)

    def w(k, shape, fan_in):
        return (jax.random.normal(k, shape, jnp.float32)
                / np.float32(np.sqrt(fan_in)))

    return dict(
        w1=w(ks[0], (F, F), F),      b1=jnp.zeros((1, F), jnp.float32),
        w2=w(ks[1], (F, F), F),      b2=jnp.zeros((1, F), jnp.float32),
        p=w(ks[2], (1, F), F),
        w_lin=w(ks[3], (F, H), F),   b_lin=w(ks[4], (1, H), F),
        w_cls=w(ks[5], (H, 1), H),   b_cls=w(ks[6], (1, 1), H),
    )


if __name__ == "__main__":
    B, N, F, R = BATCH_SIZE, NODE_NUM, NODE_LEN, RANG
    key = jax.random.PRNGKey(0)
    k_x, k_e = jax.random.split(key, 2)

    # All ordered pairs (i, j), i != j, per graph (as in Dataset.process).
    ii, jj = np.meshgrid(np.arange(N), np.arange(N), indexing='ij')
    m = ii != jj
    src0, dst0 = ii[m], jj[m]                                   # (N*(N-1),)
    src = np.concatenate([src0 + b * N for b in range(B)])
    dst = np.concatenate([dst0 + b * N for b in range(B)])
    edge_index = jnp.asarray(np.stack([src, dst]), jnp.int32)   # (2, B*N*(N-1))
    edge_attr = jax.random.uniform(k_e, (edge_index.shape[1], R), jnp.float32)
    x = jax.random.normal(k_x, (B * N, F), jnp.float32)
    batch = jnp.repeat(jnp.arange(B, dtype=jnp.int32), N)

    params = init_params(jax.random.PRNGKey(12))   # torch.manual_seed(12) analog

    out, perm = jax.jit(temporal_bcgcn_forward)(params, x, edge_index,
                                                edge_attr, batch)
    jax.block_until_ready((out, perm))
    assert out.shape == (B,) and perm.shape == (B * RETAIN_NODE,)
    assert bool(jnp.all(jnp.isfinite(out)))
    assert bool(jnp.all((perm >= 0) & (perm < B * N)))
    print("KERNEL_OK")
</pallas_src>

<mosaic_0001>
module attributes {stable_mosaic.version = 11 : i64} {
  func.func @_fused_kernel(%arg0: i32, %arg1: memref<64x64xf32, #tpu.memory_space<vmem>>, %arg2: memref<64x32xf32, #tpu.memory_space<vmem>>, %arg3: memref<32x32xf32, #tpu.memory_space<vmem>>, %arg4: memref<1x32xf32, #tpu.memory_space<vmem>>, %arg5: memref<32x32xf32, #tpu.memory_space<vmem>>, %arg6: memref<1x32xf32, #tpu.memory_space<vmem>>, %arg7: memref<1x32xf32, #tpu.memory_space<vmem>>, %arg8: memref<1x32xf32, #tpu.memory_space<vmem>>, %arg9: memref<1x1xf32, #tpu.memory_space<vmem>>, %arg10: memref<4x1xf32, #tpu.memory_space<vmem>>, %arg11: memref<4x4xi32, #tpu.memory_space<vmem>>) attributes {dimension_semantics = [#tpu.dimension_semantics<arbitrary>], iteration_bounds = array<i64: 1>, scalar_prefetch = 0 : i64, scratch_operands = 0 : i64, tpu.core_type = #tpu.core_type<tc>, window_params = [{pipeline_mode = #tpu.pipeline_mode<synchronous>, transform_indices = @transform_0, window_bounds = array<i64: 64, 64>}, {pipeline_mode = #tpu.pipeline_mode<synchronous>, transform_indices = @transform_1, window_bounds = array<i64: 64, 32>}, {pipeline_mode = #tpu.pipeline_mode<synchronous>, transform_indices = @transform_2, window_bounds = array<i64: 32, 32>}, {pipeline_mode = #tpu.pipeline_mode<synchronous>, transform_indices = @transform_3, window_bounds = array<i64: 1, 32>}, {pipeline_mode = #tpu.pipeline_mode<synchronous>, transform_indices = @transform_4, window_bounds = array<i64: 32, 32>}, {pipeline_mode = #tpu.pipeline_mode<synchronous>, transform_indices = @transform_5, window_bounds = array<i64: 1, 32>}, {pipeline_mode = #tpu.pipeline_mode<synchronous>, transform_indices = @transform_6, window_bounds = array<i64: 1, 32>}, {pipeline_mode = #tpu.pipeline_mode<synchronous>, transform_indices = @transform_7, window_bounds = array<i64: 1, 32>}, {pipeline_mode = #tpu.pipeline_mode<synchronous>, transform_indices = @transform_8, window_bounds = array<i64: 1, 1>}, {pipeline_mode = #tpu.pipeline_mode<synchronous>, transform_indices = @transform_9, window_bounds = array<i64: 4, 1>}, {pipeline_mode = #tpu.pipeline_mode<synchronous>, transform_indices = @transform_10, window_bounds = array<i64: 4, 4>}]} {
    %c0 = arith.constant 0 : index
    %c0_0 = arith.constant 0 : index
    %0 = vector.load %arg1[%c0, %c0_0] : memref<64x64xf32, #tpu.memory_space<vmem>>, vector<64x64xf32>
    %c0_1 = arith.constant 0 : index
    %c0_2 = arith.constant 0 : index
    %1 = vector.load %arg2[%c0_1, %c0_2] : memref<64x32xf32, #tpu.memory_space<vmem>>, vector<64x32xf32>
    %c0_3 = arith.constant 0 : index
    %c0_4 = arith.constant 0 : index
    %2 = vector.load %arg3[%c0_3, %c0_4] : memref<32x32xf32, #tpu.memory_space<vmem>>, vector<32x32xf32>
    %c0_5 = arith.constant 0 : index
    %c0_6 = arith.constant 0 : index
    %3 = vector.load %arg4[%c0_5, %c0_6] : memref<1x32xf32, #tpu.memory_space<vmem>>, vector<1x32xf32>
    %cst = arith.constant dense<0.000000e+00> : vector<64x32xf32>
    %4 = tpu.matmul %0, %1, %cst {dimension_numbers = #tpu.dot_dimension_numbers<[1], [0], [0], [1], [0, 0, 1, 1], [], []>} : vector<64x64xf32>, vector<64x32xf32>, vector<64x32xf32> -> vector<64x32xf32>
    %cst_7 = arith.constant dense<0.000000e+00> : vector<64x32xf32>
    %5 = tpu.matmul %4, %2, %cst_7 {dimension_numbers = #tpu.dot_dimension_numbers<[1], [0], [0], [1], [0, 0, 1, 1], [], []>} : vector<64x32xf32>, vector<32x32xf32>, vector<64x32xf32> -> vector<64x32xf32>
    %6 = vector.broadcast %3 : vector<1x32xf32> to vector<64x32xf32>
    %7 = arith.addf %5, %6 : vector<64x32xf32>
    %cst_8 = arith.constant dense<0.000000e+00> : vector<32xf32>
    %8 = vector.multi_reduction <add>, %7, %cst_8 [0] : vector<64x32xf32> to vector<32xf32>
    %9 = vector.shape_cast %8 : vector<32xf32> to vector<1x32xf32>
    %cst_9 = arith.constant 1.562500e-02 : f32
    %10 = vector.broadcast %cst_9 : f32 to vector<1x32xf32>
    %11 = arith.mulf %9, %10 : vector<1x32xf32>
    %12 = arith.mulf %7, %7 : vector<64x32xf32>
    %cst_10 = arith.constant dense<0.000000e+00> : vector<32xf32>
    %13 = vector.multi_reduction <add>, %12, %cst_10 [0] : vector<64x32xf32> to vector<32xf32>
    %14 = vector.shape_cast %13 : vector<32xf32> to vector<1x32xf32>
    %cst_11 = arith.constant 1.562500e-02 : f32
    %15 = vector.broadcast %cst_11 : f32 to vector<1x32xf32>
    %16 = arith.mulf %14, %15 : vector<1x32xf32>
    %17 = arith.mulf %11, %11 : vector<1x32xf32>
    %18 = arith.subf %16, %17 : vector<1x32xf32>
    %cst_12 = arith.constant 0.000000e+00 : f32
    %19 = vector.broadcast %cst_12 : f32 to vector<1x32xf32>
    %20 = arith.maximumf %18, %19 : vector<1x32xf32>
    %21 = vector.broadcast %11 : vector<1x32xf32> to vector<64x32xf32>
    %22 = arith.subf %7, %21 : vector<64x32xf32>
    %cst_13 = arith.constant 9.99999974E-6 : f32
    %23 = vector.broadcast %cst_13 : f32 to vector<1x32xf32>
    %24 = arith.addf %20, %23 : vector<1x32xf32>
    %25 = math.rsqrt %24 : vector<1x32xf32>
    %26 = vector.broadcast %25 : vector<1x32xf32> to vector<64x32xf32>
    %27 = arith.mulf %22, %26 : vector<64x32xf32>
    %c0_14 = arith.constant 0 : index
    %c0_15 = arith.constant 0 : index
    %28 = vector.load %arg5[%c0_14, %c0_15] : memref<32x32xf32, #tpu.memory_space<vmem>>, vector<32x32xf32>
    %c0_16 = arith.constant 0 : index
    %c0_17 = arith.constant 0 : index
    %29 = vector.load %arg6[%c0_16, %c0_17] : memref<1x32xf32, #tpu.memory_space<vmem>>, vector<1x32xf32>
    %cst_18 = arith.constant dense<0.000000e+00> : vector<64x32xf32>
    %30 = tpu.matmul %0, %27, %cst_18 {dimension_numbers = #tpu.dot_dimension_numbers<[1], [0], [0], [1], [0, 0, 1, 1], [], []>} : vector<64x64xf32>, vector<64x32xf32>, vector<64x32xf32> -> vector<64x32xf32>
    %cst_19 = arith.constant dense<0.000000e+00> : vector<64x32xf32>
    %31 = tpu.matmul %30, %28, %cst_19 {dimension_numbers = #tpu.dot_dimension_numbers<[1], [0], [0], [1], [0, 0, 1, 1], [], []>} : vector<64x32xf32>, vector<32x32xf32>, vector<64x32xf32> -> vector<64x32xf32>
    %32 = vector.broadcast %29 : vector<1x32xf32> to vector<64x32xf32>
    %33 = arith.addf %31, %32 : vector<64x32xf32>
    %cst_20 = arith.constant dense<0.000000e+00> : vector<32xf32>
    %34 = vector.multi_reduction <add>, %33, %cst_20 [0] : vector<64x32xf32> to vector<32xf32>
    %35 = vector.shape_cast %34 : vector<32xf32> to vector<1x32xf32>
    %cst_21 = arith.constant 1.562500e-02 : f32
    %36 = vector.broadcast %cst_21 : f32 to vector<1x32xf32>
    %37 = arith.mulf %35, %36 : vector<1x32xf32>
    %38 = arith.mulf %33, %33 : vector<64x32xf32>
    %cst_22 = arith.constant dense<0.000000e+00> : vector<32xf32>
    %39 = vector.multi_reduction <add>, %38, %cst_22 [0] : vector<64x32xf32> to vector<32xf32>
    %40 = vector.shape_cast %39 : vector<32xf32> to vector<1x32xf32>
    %cst_23 = arith.constant 1.562500e-02 : f32
    %41 = vector.broadcast %cst_23 : f32 to vector<1x32xf32>
    %42 = arith.mulf %40, %41 : vector<1x32xf32>
    %43 = arith.mulf %37, %37 : vector<1x32xf32>
    %44 = arith.subf %42, %43 : vector<1x32xf32>
    %cst_24 = arith.constant 0.000000e+00 : f32
    %45 = vector.broadcast %cst_24 : f32 to vector<1x32xf32>
    %46 = arith.maximumf %44, %45 : vector<1x32xf32>
    %47 = vector.broadcast %37 : vector<1x32xf32> to vector<64x32xf32>
    %48 = arith.subf %33, %47 : vector<64x32xf32>
    %cst_25 = arith.constant 9.99999974E-6 : f32
    %49 = vector.broadcast %cst_25 : f32 to vector<1x32xf32>
    %50 = arith.addf %46, %49 : vector<1x32xf32>
    %51 = math.rsqrt %50 : vector<1x32xf32>
    %52 = vector.broadcast %51 : vector<1x32xf32> to vector<64x32xf32>
    %53 = arith.mulf %48, %52 : vector<64x32xf32>
    %54 = vector.shape_cast %53 : vector<64x32xf32> to vector<4x16x32xf32>
    %c0_26 = arith.constant 0 : index
    %c0_27 = arith.constant 0 : index
    %55 = vector.load %arg7[%c0_26, %c0_27] : memref<1x32xf32, #tpu.memory_space<vmem>>, vector<1x32xf32>
    %56 = vector.shape_cast %55 : vector<1x32xf32> to vector<1x1x32xf32>
    %57 = vector.broadcast %56 : vector<1x1x32xf32> to vector<4x16x32xf32>
    %58 = arith.mulf %54, %57 : vector<4x16x32xf32>
    %cst_28 = arith.constant dense<0.000000e+00> : vector<4x16xf32>
    %59 = vector.multi_reduction <add>, %58, %cst_28 [2] : vector<4x16x32xf32> to vector<4x16xf32>
    %60 = tpu.iota {dimensions = array<i32: 1>} : vector<4x16xi32>
    %61 = tpu.iota {dimensions = array<i32: 1>} : vector<4x4xi32>
    %cst_29 = arith.constant 0.000000e+00 : f32
    %62 = vector.broadcast %cst_29 : f32 to vector<4x16xf32>
    %c0_i32 = arith.constant 0 : i32
    %63 = vector.broadcast %c0_i32 : i32 to vector<4x4xi32>
    %cst_30 = arith.constant dense<0xFF800000> : vector<4xf32>
    %64 = vector.multi_reduction <maximumf>, %59, %cst_30 [1] : vector<4x16xf32> to vector<4xf32>
    %65 = vector.shape_cast %64 : vector<4xf32> to vector<4x1xf32>
    %66 = vector.broadcast %65 : vector<4x1xf32> to vector<4x16xf32>
    %67 = arith.cmpf oeq, %59, %66 : vector<4x16xf32>
    %c16_i32 = arith.constant 16 : i32
    %68 = vector.broadcast %c16_i32 : i32 to vector<4x16xi32>
    %69 = arith.select %67, %60, %68 : vector<4x16xi1>, vector<4x16xi32>
    %cst_31 = arith.constant dense<2147483647> : vector<4xi32>
    %70 = vector.multi_reduction <minsi>, %69, %cst_31 [1] : vector<4x16xi32> to vector<4xi32>
    %71 = vector.shape_cast %70 : vector<4xi32> to vector<4x1xi32>
    %72 = vector.broadcast %71 : vector<4x1xi32> to vector<4x16xi32>
    %73 = arith.cmpi eq, %60, %72 : vector<4x16xi32>
    %74 = arith.extui %73 : vector<4x16xi1> to vector<4x16xi32>
    %75 = arith.sitofp %74 : vector<4x16xi32> to vector<4x16xf32>
    %76 = arith.addf %62, %75 : vector<4x16xf32>
    %c0_i32_32 = arith.constant 0 : i32
    %77 = vector.broadcast %c0_i32_32 : i32 to vector<4x4xi32>
    %78 = arith.cmpi eq, %61, %77 : vector<4x4xi32>
    %79 = vector.shape_cast %71 : vector<4x1xi32> to vector<4x1xi32>
    %80 = vector.broadcast %79 : vector<4x1xi32> to vector<4x4xi32>
    %81 = arith.select %78, %80, %63 : vector<4x4xi1>, vector<4x4xi32>
    %cst_33 = arith.constant 0xFF800000 : f32
    %82 = vector.broadcast %cst_33 : f32 to vector<4x16xf32>
    %83 = arith.select %73, %82, %59 : vector<4x16xi1>, vector<4x16xf32>
    %cst_34 = arith.constant dense<0xFF800000> : vector<4xf32>
    %84 = vector.multi_reduction <maximumf>, %83, %cst_34 [1] : vector<4x16xf32> to vector<4xf32>
    %85 = vector.shape_cast %84 : vector<4xf32> to vector<4x1xf32>
    %86 = vector.broadcast %85 : vector<4x1xf32> to vector<4x16xf32>
    %87 = arith.cmpf oeq, %83, %86 : vector<4x16xf32>
    %c16_i32_35 = arith.constant 16 : i32
    %88 = vector.broadcast %c16_i32_35 : i32 to vector<4x16xi32>
    %89 = arith.select %87, %60, %88 : vector<4x16xi1>, vector<4x16xi32>
    %cst_36 = arith.constant dense<2147483647> : vector<4xi32>
    %90 = vector.multi_reduction <minsi>, %89, %cst_36 [1] : vector<4x16xi32> to vector<4xi32>
    %91 = vector.shape_cast %90 : vector<4xi32> to vector<4x1xi32>
    %92 = vector.broadcast %91 : vector<4x1xi32> to vector<4x16xi32>
    %93 = arith.cmpi eq, %60, %92 : vector<4x16xi32>
    %94 = arith.extui %93 : vector<4x16xi1> to vector<4x16xi32>
    %95 = arith.sitofp %94 : vector<4x16xi32> to vector<4x16xf32>
    %96 = arith.addf %76, %95 : vector<4x16xf32>
    %c1_i32 = arith.constant 1 : i32
    %97 = vector.broadcast %c1_i32 : i32 to vector<4x4xi32>
    %98 = arith.cmpi eq, %61, %97 : vector<4x4xi32>
    %99 = vector.shape_cast %91 : vector<4x1xi32> to vector<4x1xi32>
    %100 = vector.broadcast %99 : vector<4x1xi32> to vector<4x4xi32>
    %101 = arith.select %98, %100, %81 : vector<4x4xi1>, vector<4x4xi32>
    %cst_37 = arith.constant 0xFF800000 : f32
    %102 = vector.broadcast %cst_37 : f32 to vector<4x16xf32>
    %103 = arith.select %93, %102, %83 : vector<4x16xi1>, vector<4x16xf32>
    %cst_38 = arith.constant dense<0xFF800000> : vector<4xf32>
    %104 = vector.multi_reduction <maximumf>, %103, %cst_38 [1] : vector<4x16xf32> to vector<4xf32>
    %105 = vector.shape_cast %104 : vector<4xf32> to vector<4x1xf32>
    %106 = vector.broadcast %105 : vector<4x1xf32> to vector<4x16xf32>
    %107 = arith.cmpf oeq, %103, %106 : vector<4x16xf32>
    %c16_i32_39 = arith.constant 16 : i32
    %108 = vector.broadcast %c16_i32_39 : i32 to vector<4x16xi32>
    %109 = arith.select %107, %60, %108 : vector<4x16xi1>, vector<4x16xi32>
    %cst_40 = arith.constant dense<2147483647> : vector<4xi32>
    %110 = vector.multi_reduction <minsi>, %109, %cst_40 [1] : vector<4x16xi32> to vector<4xi32>
    %111 = vector.shape_cast %110 : vector<4xi32> to vector<4x1xi32>
    %112 = vector.broadcast %111 : vector<4x1xi32> to vector<4x16xi32>
    %113 = arith.cmpi eq, %60, %112 : vector<4x16xi32>
    %114 = arith.extui %113 : vector<4x16xi1> to vector<4x16xi32>
    %115 = arith.sitofp %114 : vector<4x16xi32> to vector<4x16xf32>
    %116 = arith.addf %96, %115 : vector<4x16xf32>
    %c2_i32 = arith.constant 2 : i32
    %117 = vector.broadcast %c2_i32 : i32 to vector<4x4xi32>
    %118 = arith.cmpi eq, %61, %117 : vector<4x4xi32>
    %119 = vector.shape_cast %111 : vector<4x1xi32> to vector<4x1xi32>
    %120 = vector.broadcast %119 : vector<4x1xi32> to vector<4x4xi32>
    %121 = arith.select %118, %120, %101 : vector<4x4xi1>, vector<4x4xi32>
    %cst_41 = arith.constant 0xFF800000 : f32
    %122 = vector.broadcast %cst_41 : f32 to vector<4x16xf32>
    %123 = arith.select %113, %122, %103 : vector<4x16xi1>, vector<4x16xf32>
    %cst_42 = arith.constant dense<0xFF800000> : vector<4xf32>
    %124 = vector.multi_reduction <maximumf>, %123, %cst_42 [1] : vector<4x16xf32> to vector<4xf32>
    %125 = vector.shape_cast %124 : vector<4xf32> to vector<4x1xf32>
    %126 = vector.broadcast %125 : vector<4x1xf32> to vector<4x16xf32>
    %127 = arith.cmpf oeq, %123, %126 : vector<4x16xf32>
    %c16_i32_43 = arith.constant 16 : i32
    %128 = vector.broadcast %c16_i32_43 : i32 to vector<4x16xi32>
    %129 = arith.select %127, %60, %128 : vector<4x16xi1>, vector<4x16xi32>
    %cst_44 = arith.constant dense<2147483647> : vector<4xi32>
    %130 = vector.multi_reduction <minsi>, %129, %cst_44 [1] : vector<4x16xi32> to vector<4xi32>
    %131 = vector.shape_cast %130 : vector<4xi32> to vector<4x1xi32>
    %132 = vector.broadcast %131 : vector<4x1xi32> to vector<4x16xi32>
    %133 = arith.cmpi eq, %60, %132 : vector<4x16xi32>
    %134 = arith.extui %133 : vector<4x16xi1> to vector<4x16xi32>
    %135 = arith.sitofp %134 : vector<4x16xi32> to vector<4x16xf32>
    %136 = arith.addf %116, %135 : vector<4x16xf32>
    %c3_i32 = arith.constant 3 : i32
    %137 = vector.broadcast %c3_i32 : i32 to vector<4x4xi32>
    %138 = arith.cmpi eq, %61, %137 : vector<4x4xi32>
    %139 = vector.shape_cast %131 : vector<4x1xi32> to vector<4x1xi32>
    %140 = vector.broadcast %139 : vector<4x1xi32> to vector<4x4xi32>
    %141 = arith.select %138, %140, %121 : vector<4x4xi1>, vector<4x4xi32>
    %c0_45 = arith.constant 0 : index
    %c0_46 = arith.constant 0 : index
    %142 = vector.load %arg11[%c0_45, %c0_46] : memref<4x4xi32, #tpu.memory_space<vmem>>, vector<4x4xi32>
    tpu.vector_store %arg11[%c0_45, %c0_46], %141 {strides = array<i32>} : memref<4x4xi32, #tpu.memory_space<vmem>>, vector<4x4xi32>,
    %143 = math.tanh %59 : vector<4x16xf32>
    %144 = arith.mulf %136, %143 : vector<4x16xf32>
    %145 = vector.shape_cast %144 : vector<4x16xf32> to vector<4x16x1xf32>
    %146 = vector.broadcast %145 : vector<4x16x1xf32> to vector<4x16x32xf32>
    %147 = arith.mulf %54, %146 : vector<4x16x32xf32>
    %cst_47 = arith.constant dense<0.000000e+00> : vector<4x32xf32>
    %148 = vector.multi_reduction <add>, %147, %cst_47 [1] : vector<4x16x32xf32> to vector<4x32xf32>
    %cst_48 = arith.constant 2.500000e-01 : f32
    %149 = vector.broadcast %cst_48 : f32 to vector<4x32xf32>
    %150 = arith.mulf %148, %149 : vector<4x32xf32>
    %151 = arith.negf %150 : vector<4x32xf32>
    %152 = math.exp %151 : vector<4x32xf32>
    %cst_49 = arith.constant 1.000000e+00 : f32
    %153 = vector.broadcast %cst_49 : f32 to vector<4x32xf32>
    %154 = arith.addf %153, %152 : vector<4x32xf32>
    %155 = arith.divf %153, %154 : vector<4x32xf32>
    %c0_50 = arith.constant 0 : index
    %c0_51 = arith.constant 0 : index
    %156 = vector.load %arg8[%c0_50, %c0_51] : memref<1x32xf32, #tpu.memory_space<vmem>>, vector<1x32xf32>
    %157 = vector.broadcast %156 : vector<1x32xf32> to vector<4x32xf32>
    %158 = arith.mulf %155, %157 : vector<4x32xf32>
    %cst_52 = arith.constant dense<0.000000e+00> : vector<4xf32>
    %159 = vector.multi_reduction <add>, %158, %cst_52 [1] : vector<4x32xf32> to vector<4xf32>
    %160 = vector.shape_cast %159 : vector<4xf32> to vector<4x1xf32>
    %c0_53 = arith.constant 0 : index
    %c0_54 = arith.constant 0 : index
    %161 = vector.load %arg9[%c0_53, %c0_54] : memref<1x1xf32, #tpu.memory_space<vmem>>, vector<1x1xf32>
    %162 = vector.broadcast %161 : vector<1x1xf32> to vector<4x1xf32>
    %163 = arith.addf %160, %162 : vector<4x1xf32>
    %164 = arith.negf %163 : vector<4x1xf32>
    %165 = math.exp %164 : vector<4x1xf32>
    %cst_55 = arith.constant 1.000000e+00 : f32
    %166 = vector.broadcast %cst_55 : f32 to vector<4x1xf32>
    %167 = arith.addf %166, %165 : vector<4x1xf32>
    %168 = arith.divf %166, %167 : vector<4x1xf32>
    %c0_56 = arith.constant 0 : index
    %c0_57 = arith.constant 0 : index
    %169 = vector.load %arg10[%c0_56, %c0_57] : memref<4x1xf32, #tpu.memory_space<vmem>>, vector<4x1xf32>
    tpu.vector_store %arg10[%c0_56, %c0_57], %168 {strides = array<i32>} : memref<4x1xf32, #tpu.memory_space<vmem>>, vector<4x1xf32>,
    return
  }
  func.func @transform_0(%arg0: i32) -> (i32, i32) {
    %c0_i32 = arith.constant 0 : i32
    %c0_i32_0 = arith.constant 0 : i32
    %c0_i32_1 = arith.constant 0 : i32
    return %c0_i32, %c0_i32_0 : i32, i32
  }
  func.func @transform_1(%arg0: i32) -> (i32, i32) {
    %c0_i32 = arith.constant 0 : i32
    %c0_i32_0 = arith.constant 0 : i32
    %c0_i32_1 = arith.constant 0 : i32
    return %c0_i32, %c0_i32_0 : i32, i32
  }
  func.func @transform_2(%arg0: i32) -> (i32, i32) {
    %c0_i32 = arith.constant 0 : i32
    %c0_i32_0 = arith.constant 0 : i32
    %c0_i32_1 = arith.constant 0 : i32
    return %c0_i32, %c0_i32_0 : i32, i32
  }
  func.func @transform_3(%arg0: i32) -> (i32, i32) {
    %c0_i32 = arith.constant 0 : i32
    %c0_i32_0 = arith.constant 0 : i32
    %c0_i32_1 = arith.constant 0 : i32
    return %c0_i32, %c0_i32_0 : i32, i32
  }
  func.func @transform_4(%arg0: i32) -> (i32, i32) {
    %c0_i32 = arith.constant 0 : i32
    %c0_i32_0 = arith.constant 0 : i32
    %c0_i32_1 = arith.constant 0 : i32
    return %c0_i32, %c0_i32_0 : i32, i32
  }
  func.func @transform_5(%arg0: i32) -> (i32, i32) {
    %c0_i32 = arith.constant 0 : i32
    %c0_i32_0 = arith.constant 0 : i32
    %c0_i32_1 = arith.constant 0 : i32
    return %c0_i32, %c0_i32_0 : i32, i32
  }
  func.func @transform_6(%arg0: i32) -> (i32, i32) {
    %c0_i32 = arith.constant 0 : i32
    %c0_i32_0 = arith.constant 0 : i32
    %c0_i32_1 = arith.constant 0 : i32
    return %c0_i32, %c0_i32_0 : i32, i32
  }
  func.func @transform_7(%arg0: i32) -> (i32, i32) {
    %c0_i32 = arith.constant 0 : i32
    %c0_i32_0 = arith.constant 0 : i32
    %c0_i32_1 = arith.constant 0 : i32
    return %c0_i32, %c0_i32_0 : i32, i32
  }
  func.func @transform_8(%arg0: i32) -> (i32, i32) {
    %c0_i32 = arith.constant 0 : i32
    %c0_i32_0 = arith.constant 0 : i32
    %c0_i32_1 = arith.constant 0 : i32
    return %c0_i32, %c0_i32_0 : i32, i32
  }
  func.func @transform_9(%arg0: i32) -> (i32, i32) {
    %c0_i32 = arith.constant 0 : i32
    %c0_i32_0 = arith.constant 0 : i32
    %c0_i32_1 = arith.constant 0 : i32
    return %c0_i32, %c0_i32_0 : i32, i32
  }
  func.func @transform_10(%arg0: i32) -> (i32, i32) {
    %c0_i32 = arith.constant 0 : i32
    %c0_i32_0 = arith.constant 0 : i32
    %c0_i32_1 = arith.constant 0 : i32
    return %c0_i32, %c0_i32_0 : i32, i32
  }
}

</mosaic_0001>

<bundles_post_ra>
// kernel: temporal_bcgcn_forward.1
= control target key start
LH: loop header
LB: loop body
LE: loop exit
PB: predicated region body
PF: predicated region fallthrough
CT: control target
= control target key end

     0   :  { %vm57_vm0 = vcmask 523264   ;;  %vm126_vm1 = vcmask 261120   ;;  %vm519_vm8 = vcmask 130112   ;;  %vm530_vm9 = vcmask 1041409   ;;  %s1611_s1 = inlined_call_operand.vmem [shape: f32[64,32], index: 1, kind: input, shape index: {}]   ;;  %s1612_s0 = inlined_call_operand.vmem [shape: f32[64,64], index: 0, kind: input, shape index: {}]   ;;  %s1613_s2 = inlined_call_operand.vmem [shape: f32[32,32], index: 2, kind: input, shape index: {}]   ;;  %s1614_s3 = inlined_call_operand.vmem [shape: f32[1,32], index: 3, kind: input, shape index: {}]   ;;  %s1615_s4 = inlined_call_operand.vmem [shape: f32[32,32], index: 4, kind: input, shape index: {}]   ;;  %s1616_s5 = inlined_call_operand.vmem [shape: f32[1,32], index: 5, kind: input, shape index: {}]   ;;  %s1617_s6 = inlined_call_operand.vmem [shape: f32[1,32], index: 6, kind: input, shape index: {}]   ;;  %s1618_s10 = inlined_call_operand.vmem [shape: s32[4,4], index: 10, kind: output, shape index: {1}]   ;;  %s1619_s7 = inlined_call_operand.vmem [shape: f32[1,32], index: 7, kind: input, shape index: {}]   ;;  %s1620_s8 = inlined_call_operand.<no memory space> [shape: f32[1,1], index: 8, kind: input, shape index: {}]   ;;  %s1621_s9 = inlined_call_operand.vmem [shape: f32[4,1], index: 9, kind: output, shape index: {0}]  }
   0x1   :  { %v51_v0 = vld [vmem:[%s1611_s1 + $0x38] sm:$0xff]  ;;  %v50_v1 = vld [vmem:[%s1611_s1 + $0x30] sm:$0xff]  ;;  %v49_v2 = vld [vmem:[%s1611_s1 + $0x28] sm:$0xff]  ;;  %vm532_vm10 = vcmask 1042434   ;;  %vm534_vm11 = vcmask 1043459   ;;  %vm537_vm12 = vcmask 125952  }
   0x2   :  { %90 = vmatpush.msra.mxu0 %v51_v0  ;;  %v48_v3 = vld [vmem:[%s1611_s1 + $0x20] sm:$0xff]  ;;  %v47_v4 = vld [vmem:[%s1611_s1 + $0x18] sm:$0xff]  ;;  %v46_v5 = vld [vmem:[%s1611_s1 + $0x10] sm:$0xff] }
   0x3   :  { %v45_v6 = vld [vmem:[%s1611_s1 + $0x8] sm:$0xff]  ;;  %v44_v7 = vld [vmem:[%s1611_s1] sm:$0xff]  ;;  %v1182_v10 = vld [vmem:[%s1612_s0 + $0x10] sm:$0xff] }
   0x4   :  { %91 = vmatpush.msra.mxu0 %v50_v1  ;;  %v1168_v8 = vld [vmem:[%s1612_s0] sm:$0xff]  ;;  %v1175_v9 = vld [vmem:[%s1612_s0 + $0x8] sm:$0xff]  ;;  %v1189_v11 = vld [vmem:[%s1612_s0 + $0x18] sm:$0xff] }
   0x5   :  { %v55_v12 = vld [vmem:[%s1613_s2 + $0x18] sm:$0xff]  ;;  %v54_v13 = vld [vmem:[%s1613_s2 + $0x10] sm:$0xff]  ;;  %v53_v14 = vld [vmem:[%s1613_s2 + $0x8] sm:$0xff] }
   0x6   :  { %92 = vmatpush.msra.mxu0 %v49_v2  ;;  %163 = vmatpush.msra.mxu1 %v55_v12  ;;  %v1205_v15 = vld [vmem:[%s1612_s0 + $0x20] sm:$0xff]  ;;  %v1212_v16 = vld [vmem:[%s1612_s0 + $0x28] sm:$0xff]  ;;  %v1219_v17 = vld [vmem:[%s1612_s0 + $0x30] sm:$0xff] }
   0x7   :  { %v1226_v18 = vld [vmem:[%s1612_s0 + $0x38] sm:$0xff]  ;;  %v52_v19 = vld [vmem:[%s1613_s2] sm:$0xff] }
   0x8   :  { %93 = vmatpush.msra.mxu0 %v48_v3  ;;  %164 = vmatpush.msra.mxu1 %v54_v13  ;;  %v1039_v33 = vld [vmem:[%s1614_s3] ss:$0 sm:$0xff] }
   0xa   :  { %94 = vmatpush.msra.mxu0 %v47_v4  ;;  %165 = vmatpush.msra.mxu1 %v53_v14 }
   0xc   :  { %95 = vmatpush.msra.mxu0 %v46_v5  ;;  %166 = vmatpush.msra.mxu1 %v52_v19 }
   0xe   :  { %96 = vmatpush.msra.mxu0 %v45_v6 }
  0x10   :  { %97 = vmatpush.msra.mxu0 %v44_v7 }
  0x11   :  { %987 = vmatmul.msk.f32.vlgmr.msra.gmra.mxu0 %vm57_vm0, %v1168_v8 }
  0x19   :  { %988 = vmatmul.msk.f32.gmra.mxu0 %vm57_vm0, %v1175_v9 }
  0x21   :  { %989 = vmatmul.msk.f32.gmra.mxu0 %vm57_vm0, %v1182_v10 }
  0x29   :  { %990 = vmatmul.msk.f32.gmra.mxu0 %vm57_vm0, %v1189_v11 }
  0x31   :  { %991 = vmatmul.msk.f32.gmra.mxu0 %vm57_vm0, %v1205_v15 }
  0x39   :  { %992 = vmatmul.msk.f32.gmra.mxu0 %vm57_vm0, %v1212_v16 }
  0x41   :  { %993 = vmatmul.msk.f32.gmra.mxu0 %vm57_vm0, %v1219_v17 }
  0x49   :  { %994 = vmatmul.msk.f32.gmra.mxu0 %vm57_vm0, %v1226_v18 }
  0x8e   :  { %v99_v20 = vpop.f32.mrf.mxu0 }
  0x8f   :  { %995 = vmatmul.msk.f32.vlgmr.msra.gmra.mxu1 %vm126_vm1, %v99_v20 }
  0x96   :  { %v102_v21 = vpop.f32.mrf.mxu0 }
  0x97   :  { %996 = vmatmul.msk.f32.gmra.mxu1 %vm126_vm1, %v102_v21 }
  0x9e   :  { %v105_v22 = vpop.f32.mrf.mxu0 }
  0x9f   :  { %997 = vmatmul.msk.f32.gmra.mxu1 %vm126_vm1, %v105_v22 }
  0xa6   :  { %v108_v23 = vpop.f32.mrf.mxu0 }
  0xa7   :  { %998 = vmatmul.msk.f32.gmra.mxu1 %vm126_vm1, %v108_v23 }
  0xae   :  { %v111_v24 = vpop.f32.mrf.mxu0 }
  0xaf   :  { %999 = vmatmul.msk.f32.gmra.mxu1 %vm126_vm1, %v111_v24 }
  0xb6   :  { %v114_v25 = vpop.f32.mrf.mxu0 }
  0xb7   :  { %1000 = vmatmul.msk.f32.gmra.mxu1 %vm126_vm1, %v114_v25 }
  0xbe   :  { %v117_v26 = vpop.f32.mrf.mxu0 }
  0xbf   :  { %1001 = vmatmul.msk.f32.gmra.mxu1 %vm126_vm1, %v117_v26 }
  0xc6   :  { %v120_v27 = vpop.f32.mrf.mxu0 }
  0xc7   :  { %1002 = vmatmul.msk.f32.gmra.mxu1 %vm126_vm1, %v120_v27 }
 0x10c   :  { %v168_v28 = vpop.f32.mrf.mxu1 }
 0x10d   :  { %v1246_v35 = vadd.f32 %v1039_v33, %v168_v28 }
 0x10f   :  { %v214_v40 = vmul.f32 %v1246_v35, %v1246_v35  ;;  %v192_v44 = vsel %vm126_vm1, %v1246_v35, 0.0 }
 0x111   :  { %v222_v49 = vsel %vm126_vm1, %v214_v40, 0.0 }
 0x114   :  { %v171_v29 = vpop.f32.mrf.mxu1 }
 0x115   :  { %v1244_v34 = vadd.f32 %v1039_v33, %v171_v29 }
 0x117   :  { %v215_v38 = vmul.f32 %v1244_v34, %v1244_v34  ;;  %v193_v41 = vsel %vm126_vm1, %v1244_v34, 0.0 }
 0x118   :  { %v194_v50 = vadd.f32 %v193_v41, %v192_v44 }
 0x119   :  { %v223_v45 = vsel %vm126_vm1, %v215_v38, 0.0 }
 0x11a   :  { %v224_v56 = vadd.f32 %v223_v45, %v222_v49 }
 0x11c   :  { %v174_v30 = vpop.f32.mrf.mxu1 }
 0x11d   :  { %v1248_v37 = vadd.f32 %v1039_v33, %v174_v30 }
 0x11f   :  { %v216_v42 = vmul.f32 %v1248_v37, %v1248_v37  ;;  %v195_v46 = vsel %vm126_vm1, %v1248_v37, 0.0 }
 0x120   :  { %v196_v57 = vadd.f32 %v195_v46, %v194_v50 }
 0x121   :  { %v225_v52 = vsel %vm126_vm1, %v216_v42, 0.0 }
 0x122   :  { %v226_v61 = vadd.f32 %v225_v52, %v224_v56 }
 0x124   :  { %v177_v31 = vpop.f32.mrf.mxu1 }
 0x125   :  { %v1252_v39 = vadd.f32 %v1039_v33, %v177_v31 }
 0x127   :  { %v217_v47 = vmul.f32 %v1252_v39, %v1252_v39  ;;  %v197_v53 = vsel %vm126_vm1, %v1252_v39, 0.0 }
 0x128   :  { %v198_v62 = vadd.f32 %v197_v53, %v196_v57 }
 0x129   :  { %v227_v58 = vsel %vm126_vm1, %v217_v47, 0.0 }
 0x12a   :  { %v228_v2 = vadd.f32 %v227_v58, %v226_v61 }
 0x12c   :  { %v180_v32 = vpop.f32.mrf.mxu1 }
 0x12d   :  { %v1260_v43 = vadd.f32 %v1039_v33, %v180_v32 }
 0x12f   :  { %v218_v54 = vmul.f32 %v1260_v43, %v1260_v43  ;;  %v199_v59 = vsel %vm126_vm1, %v1260_v43, 0.0 }
 0x130   :  { %v200_v3 = vadd.f32 %v199_v59, %v198_v62 }
 0x131   :  { %v229_v63 = vsel %vm126_vm1, %v218_v54, 0.0 }
 0x132   :  { %v230_v6 = vadd.f32 %v229_v63, %v228_v2 }
 0x134   :  { %v183_v36 = vpop.f32.mrf.mxu1 }
 0x135   :  { %v1269_v48 = vadd.f32 %v1039_v33, %v183_v36 }
 0x137   :  { %v219_v60 = vmul.f32 %v1269_v48, %v1269_v48  ;;  %v201_v0 = vsel %vm126_vm1, %v1269_v48, 0.0 }
 0x138   :  { %v202_v7 = vadd.f32 %v201_v0, %v200_v3 }
 0x139   :  { %v231_v4 = vsel %vm126_vm1, %v219_v60, 0.0 }
 0x13a   :  { %v232_v19 = vadd.f32 %v231_v4, %v230_v6 }
 0x13c   :  { %v186_v51 = vpop.f32.mrf.mxu1 }
 0x13d   :  { %v187_v55 = vadd.f32 %v1039_v33, %v186_v51 }
 0x13f   :  { %v220_v1 = vmul.f32 %v187_v55, %v187_v55  ;;  %v203_v5 = vsel %vm126_vm1, %v187_v55, 0.0 }
 0x140   :  { %v204_v20 = vadd.f32 %v203_v5, %v202_v7 }
 0x141   :  { %v233_v13 = vsel %vm126_vm1, %v220_v1, 0.0 }
 0x142   :  { %v234_v23 = vadd.f32 %v233_v13, %v232_v19 }
 0x144   :  { %v189_v12 = vpop.f32.mrf.mxu1 }
 0x145   :  { %v190_v14 = vadd.f32 %v1039_v33, %v189_v12 }
 0x147   :  { %v205_v21 = vsel %vm126_vm1, %v190_v14, 0.0  ;;  %v221_v22 = vmul.f32 %v190_v14, %v190_v14 }
 0x148   :  { %v206_v24 = vadd.f32 %v205_v21, %v204_v20  ;;  %v1040_v21 = vld [vmem:[%s1616_s5] ss:$0 sm:$0xff] }
 0x149   :  { %v235_v25 = vsel %vm126_vm1, %v221_v22, 0.0 }
 0x14a   :  { %v207_v26 = vrot.slane %v206_v24, 4  ;;  %v236_v27 = vadd.f32 %v235_v25, %v234_v23 }
 0x14c   :  { %v208_v28 = vadd.f32 %v207_v26, %v206_v24  ;;  %v237_v29 = vrot.slane %v236_v27, 4 }
 0x14e   :  { %v209_v30 = vrot.slane %v208_v28, 2  ;;  %v238_v31 = vadd.f32 %v237_v29, %v236_v27 }
 0x150   :  { %v210_v32 = vadd.f32 %v209_v30, %v208_v28  ;;  %v239_v36 = vrot.slane %v238_v31, 2 }
 0x152   :  { %v211_v38 = vrot.slane %v210_v32, 1  ;;  %v240_v40 = vadd.f32 %v239_v36, %v238_v31 }
 0x154   :  { %v212_v33 = vadd.f32 %v211_v38, %v210_v32  ;;  %v241_v41 = vrot.slane %v240_v40, 1 }
 0x156   :  { %v213_v42 = vmul.f32 0.015625, %v212_v33  ;;  %v242_v44 = vadd.f32 %v241_v41, %v240_v40 }
 0x158   :  { %v243_v45 = vmul.f32 0.015625, %v242_v44  ;;  %v244_v46 = vmul.f32 %v213_v42, %v213_v42  ;;  %v254_v58 = vsub.f32 %v190_v14, %v213_v42  ;;  %v253_v61 = vsub.f32 %v187_v55, %v213_v42 }
 0x159   :  { %v252_v63 = vsub.f32 %v1269_v48, %v213_v42  ;;  %v251_v1 = vsub.f32 %v1260_v43, %v213_v42  ;;  %v250_v3 = vsub.f32 %v1252_v39, %v213_v42  ;;  %v249_v5 = vsub.f32 %v1248_v37, %v213_v42 }
 0x15a   :  { %v245_v47 = vsub.f32 %v243_v45, %v244_v46  ;;  %v248_v55 = vsub.f32 %v1244_v34, %v213_v42  ;;  %v247_v48 = vsub.f32 %v1246_v35, %v213_v42  ;;  %v277_v34 = vld [vmem:[%s1615_s4 + $0x18] sm:$0xff]  ;;  %v276_v35 = vld [vmem:[%s1615_s4 + $0x10] sm:$0xff] }
 0x15b   :  { %359 = vmatpush.msra.mxu3 %v277_v34 }
 0x15c   :  { %v246_v49 = vmax.f32 %v245_v47, 0.0 }
 0x15d   :  { %360 = vmatpush.msra.mxu3 %v276_v35 }
 0x15e   :  { %v255_v50 = vadd.f32 1e-05, %v246_v49 }
 0x160   :  { %1044 = vrsqrt.f32 %v255_v50  ;;  %vm262_vm3 = vweird.f32 %v255_v50 }
 0x166   :  { %v1045_v51 = vpop.eup %1044 }
 0x167   :  { %v257_v52 = vmul.f32 %v1045_v51, %v255_v50  ;;  %vm263_vm2 = vweird.f32 %v1045_v51 }
 0x168   :  { %vm264_vm4 = vmor %vm262_vm3, %vm263_vm2 }
 0x169   :  { %v258_v53 = vmul.f32 %v1045_v51, %v257_v52 }
 0x16b   :  { %v259_v54 = vmul.f32 0.5, %v258_v53 }
 0x16d   :  { %v260_v56 = vsub.f32 1.5, %v259_v54 }
 0x16f   :  { %v261_v57 = vmul.f32 %v1045_v51, %v260_v56 }
 0x171   :  { %v265_v59 = vsel %vm264_vm4, %v1045_v51, %v261_v57 }
 0x172   :  { %v273_v60 = vmul.f32 %v265_v59, %v254_v58  ;;  %v272_v62 = vmul.f32 %v265_v59, %v253_v61  ;;  %v271_v0 = vmul.f32 %v265_v59, %v252_v63  ;;  %v270_v2 = vmul.f32 %v265_v59, %v251_v1 }
 0x173   :  { %v269_v4 = vmul.f32 %v265_v59, %v250_v3  ;;  %v268_v6 = vmul.f32 %v265_v59, %v249_v5  ;;  %v267_v7 = vmul.f32 %v265_v59, %v248_v55  ;;  %v266_v12 = vmul.f32 %v265_v59, %v247_v48 }
 0x174   :  { %287 = vmatpush.msra.mxu2 %v273_v60 }
 0x176   :  { %288 = vmatpush.msra.mxu2 %v272_v62 }
 0x178   :  { %289 = vmatpush.msra.mxu2 %v271_v0 }
 0x17a   :  { %290 = vmatpush.msra.mxu2 %v270_v2 }
 0x17c   :  { %291 = vmatpush.msra.mxu2 %v269_v4 }
 0x17e   :  { %292 = vmatpush.msra.mxu2 %v268_v6 }
 0x180   :  { %293 = vmatpush.msra.mxu2 %v267_v7 }
 0x182   :  { %294 = vmatpush.msra.mxu2 %v266_v12 }
 0x183   :  { %1003 = vmatmul.msk.f32.vlgmr.msra.gmra.mxu2 %vm57_vm0, %v1168_v8  ;;  %v275_v8 = vld [vmem:[%s1615_s4 + $0x8] sm:$0xff] }
 0x184   :  { %361 = vmatpush.msra.mxu3 %v275_v8 }
 0x18b   :  { %1004 = vmatmul.msk.f32.gmra.mxu2 %vm57_vm0, %v1175_v9  ;;  %v274_v9 = vld [vmem:[%s1615_s4] sm:$0xff] }
 0x18c   :  { %362 = vmatpush.msra.mxu3 %v274_v9 }
 0x193   :  { %1005 = vmatmul.msk.f32.gmra.mxu2 %vm57_vm0, %v1182_v10 }
 0x19b   :  { %1006 = vmatmul.msk.f32.gmra.mxu2 %vm57_vm0, %v1189_v11 }
 0x1a3   :  { %1007 = vmatmul.msk.f32.gmra.mxu2 %vm57_vm0, %v1205_v15 }
 0x1ab   :  { %1008 = vmatmul.msk.f32.gmra.mxu2 %vm57_vm0, %v1212_v16 }
 0x1b3   :  { %1009 = vmatmul.msk.f32.gmra.mxu2 %vm57_vm0, %v1219_v17 }
 0x1bb   :  { %1010 = vmatmul.msk.f32.gmra.mxu2 %vm57_vm0, %v1226_v18 }
 0x206   :  { %v296_v10 = vpop.f32.mrf.mxu2 }
 0x207   :  { %1011 = vmatmul.msk.f32.vlgmr.msra.gmra.mxu3 %vm126_vm1, %v296_v10 }
 0x20e   :  { %v299_v11 = vpop.f32.mrf.mxu2 }
 0x20f   :  { %1012 = vmatmul.msk.f32.gmra.mxu3 %vm126_vm1, %v299_v11 }
 0x216   :  { %v302_v15 = vpop.f32.mrf.mxu2 }
 0x217   :  { %1013 = vmatmul.msk.f32.gmra.mxu3 %vm126_vm1, %v302_v15 }
 0x21e   :  { %v305_v16 = vpop.f32.mrf.mxu2 }
 0x21f   :  { %1014 = vmatmul.msk.f32.gmra.mxu3 %vm126_vm1, %v305_v16 }
 0x226   :  { %v308_v17 = vpop.f32.mrf.mxu2 }
 0x227   :  { %1015 = vmatmul.msk.f32.gmra.mxu3 %vm126_vm1, %v308_v17 }
 0x22e   :  { %v311_v18 = vpop.f32.mrf.mxu2 }
 0x22f   :  { %1016 = vmatmul.msk.f32.gmra.mxu3 %vm126_vm1, %v311_v18 }
 0x236   :  { %v314_v37 = vpop.f32.mrf.mxu2 }
 0x237   :  { %1017 = vmatmul.msk.f32.gmra.mxu3 %vm126_vm1, %v314_v37 }
 0x23e   :  { %v317_v39 = vpop.f32.mrf.mxu2 }
 0x23f   :  { %1018 = vmatmul.msk.f32.gmra.mxu3 %vm126_vm1, %v317_v39 }
 0x28a   :  { %v364_v43 = vpop.f32.mrf.mxu3 }
 0x28b   :  { %v1337_v23 = vadd.f32 %v1040_v21, %v364_v43 }
 0x28d   :  { %v410_v28 = vmul.f32 %v1337_v23, %v1337_v23  ;;  %v388_v32 = vsel %vm126_vm1, %v1337_v23, 0.0 }
 0x28f   :  { %v418_v41 = vsel %vm126_vm1, %v410_v28, 0.0 }
 0x292   :  { %v367_v13 = vpop.f32.mrf.mxu3 }
 0x293   :  { %v1335_v22 = vadd.f32 %v1040_v21, %v367_v13 }
 0x295   :  { %v411_v26 = vmul.f32 %v1335_v22, %v1335_v22  ;;  %v389_v29 = vsel %vm126_vm1, %v1335_v22, 0.0 }
 0x296   :  { %v390_v42 = vadd.f32 %v389_v29, %v388_v32 }
 0x297   :  { %v419_v36 = vsel %vm126_vm1, %v411_v26, 0.0 }
 0x298   :  { %v420_v50 = vadd.f32 %v419_v36, %v418_v41 }
 0x29a   :  { %v370_v14 = vpop.f32.mrf.mxu3 }
 0x29b   :  { %v1339_v25 = vadd.f32 %v1040_v21, %v370_v14 }
 0x29d   :  { %v412_v30 = vmul.f32 %v1339_v25, %v1339_v25  ;;  %v391_v38 = vsel %vm126_vm1, %v1339_v25, 0.0 }
 0x29e   :  { %v392_v51 = vadd.f32 %v391_v38, %v390_v42  ;;  %v1041_v42 = vld [vmem:[%s1617_s6] ss:$0 sm:$0xff] }
 0x29f   :  { %v421_v45 = vsel %vm126_vm1, %v412_v30, 0.0 }
 0x2a0   :  { %v422_v56 = vadd.f32 %v421_v45, %v420_v50 }
 0x2a2   :  { %v373_v19 = vpop.f32.mrf.mxu3 }
 0x2a3   :  { %v1343_v27 = vadd.f32 %v1040_v21, %v373_v19 }
 0x2a5   :  { %v413_v40 = vmul.f32 %v1343_v27, %v1343_v27  ;;  %v393_v46 = vsel %vm126_vm1, %v1343_v27, 0.0 }
 0x2a6   :  { %v394_v57 = vadd.f32 %v393_v46, %v392_v51 }
 0x2a7   :  { %v423_v52 = vsel %vm126_vm1, %v413_v40, 0.0 }
 0x2a8   :  { %v424_v61 = vadd.f32 %v423_v52, %v422_v56 }
 0x2aa   :  { %v376_v20 = vpop.f32.mrf.mxu3 }
 0x2ab   :  { %v1351_v31 = vadd.f32 %v1040_v21, %v376_v20 }
 0x2ad   :  { %v414_v47 = vmul.f32 %v1351_v31, %v1351_v31  ;;  %v395_v53 = vsel %vm126_vm1, %v1351_v31, 0.0 }
 0x2ae   :  { %v396_v62 = vadd.f32 %v395_v53, %v394_v57 }
 0x2af   :  { %v425_v58 = vsel %vm126_vm1, %v414_v47, 0.0 }
 0x2b0   :  { %v426_v1 = vadd.f32 %v425_v58, %v424_v61 }
 0x2b2   :  { %v379_v24 = vpop.f32.mrf.mxu3 }
 0x2b3   :  { %v1360_v33 = vadd.f32 %v1040_v21, %v379_v24 }
 0x2b5   :  { %v415_v54 = vmul.f32 %v1360_v33, %v1360_v33  ;;  %v397_v59 = vsel %vm126_vm1, %v1360_v33, 0.0 }
 0x2b6   :  { %v398_v2 = vadd.f32 %v397_v59, %v396_v62 }
 0x2b7   :  { %v427_v63 = vsel %vm126_vm1, %v415_v54, 0.0 }
 0x2b8   :  { %v428_v6 = vadd.f32 %v427_v63, %v426_v1 }
 0x2ba   :  { %v382_v44 = vpop.f32.mrf.mxu3 }
 0x2bb   :  { %v1368_v49 = vadd.f32 %v1040_v21, %v382_v44 }
 0x2bd   :  { %v416_v60 = vmul.f32 %v1368_v49, %v1368_v49  ;;  %v399_v0 = vsel %vm126_vm1, %v1368_v49, 0.0 }
 0x2be   :  { %v400_v55 = vadd.f32 %v399_v0, %v398_v2 }
 0x2bf   :  { %v429_v4 = vsel %vm126_vm1, %v416_v60, 0.0 }
 0x2c0   :  { %v430_v12 = vadd.f32 %v429_v4, %v428_v6 }
 0x2c2   :  { %v385_v3 = vpop.f32.mrf.mxu3 }
 0x2c3   :  { %v1384_v5 = vadd.f32 %v1040_v21, %v385_v3 }
 0x2c5   :  { %v401_v7 = vsel %vm126_vm1, %v1384_v5, 0.0  ;;  %v417_v48 = vmul.f32 %v1384_v5, %v1384_v5 }
 0x2c6   :  { %v402_v34 = vadd.f32 %v401_v7, %v400_v55  ;;  %v506_v7 = vlaneseq }
 0x2c7   :  { %v431_v35 = vsel %vm126_vm1, %v417_v48, 0.0 }
 0x2c8   :  { %v403_v8 = vrot.slane %v402_v34, 4  ;;  %v432_v9 = vadd.f32 %v431_v35, %v430_v12  ;;  %v1434_v48 = vshrl.u32 %v506_v7, 7 }
 0x2ca   :  { %v404_v10 = vadd.f32 %v403_v8, %v402_v34  ;;  %v433_v11 = vrot.slane %v432_v9, 4  ;;  %1030 = vset.pattern.permute.xlu0 %v1434_v48  ;;  %v1438_v12 = vadd.s32 8, %v1434_v48  ;;  %v1441_v34 = vand.u32 127, %v506_v7 }
 0x2cc   :  { %v405_v15 = vrot.slane %v404_v10, 2  ;;  %v434_v16 = vadd.f32 %v433_v11, %v432_v9  ;;  %1031 = vset.pattern.permute.xlu1 %v1438_v12 }
 0x2ce   :  { %v406_v17 = vadd.f32 %v405_v15, %v404_v10  ;;  %v435_v18 = vrot.slane %v434_v16, 2  ;;  %v1452_v10 = vadd.s32 4294967288, %v1441_v34 }
 0x2d0   :  { %v407_v37 = vrot.slane %v406_v17, 1  ;;  %v436_v39 = vadd.f32 %v435_v18, %v434_v16 }
 0x2d2   :  { %v408_v43 = vadd.f32 %v407_v37, %v406_v17  ;;  %v437_v13 = vrot.slane %v436_v39, 1 }
 0x2d4   :  { %v409_v14 = vmul.f32 0.015625, %v408_v43  ;;  %v438_v19 = vadd.f32 %v437_v13, %v436_v39 }
 0x2d6   :  { %v439_v20 = vmul.f32 0.015625, %v438_v19  ;;  %v440_v21 = vmul.f32 %v409_v14, %v409_v14  ;;  %v447_v41 = vsub.f32 %v1351_v31, %v409_v14  ;;  %v445_v44 = vsub.f32 %v1339_v25, %v409_v14 }
 0x2d7   :  { %v443_v45 = vsub.f32 %v1337_v23, %v409_v14  ;;  %v448_v52 = vsub.f32 %v1360_v33, %v409_v14  ;;  %v446_v56 = vsub.f32 %v1343_v27, %v409_v14  ;;  %v444_v23 = vsub.f32 %v1335_v22, %v409_v14 }
 0x2d8   :  { %v441_v24 = vsub.f32 %v439_v20, %v440_v21  ;;  %v450_v22 = vsub.f32 %v1384_v5, %v409_v14  ;;  %v449_v63 = vsub.f32 %v1368_v49, %v409_v14 }
 0x2da   :  { %v442_v26 = vmax.f32 %v441_v24, 0.0 }
 0x2dc   :  { %v451_v28 = vadd.f32 1e-05, %v442_v26 }
 0x2de   :  { %1046 = vrsqrt.f32 %v451_v28  ;;  %vm458_vm6 = vweird.f32 %v451_v28 }
 0x2e4   :  { %v1047_v29 = vpop.eup %1046 }
 0x2e5   :  { %v453_v30 = vmul.f32 %v1047_v29, %v451_v28  ;;  %vm459_vm5 = vweird.f32 %v1047_v29 }
 0x2e6   :  { %vm460_vm7 = vmor %vm458_vm6, %vm459_vm5 }
 0x2e7   :  { %v454_v32 = vmul.f32 %v1047_v29, %v453_v30 }
 0x2e9   :  { %v455_v36 = vmul.f32 0.5, %v454_v32 }
 0x2eb   :  { %v456_v38 = vsub.f32 1.5, %v455_v36 }
 0x2ed   :  { %v457_v40 = vmul.f32 %v1047_v29, %v456_v38 }
 0x2ef   :  { %v461_v46 = vsel %vm460_vm7, %v1047_v29, %v457_v40  ;;  %v1084_v40 = vmov 0  }
 0x2f0   :  { %v1397_v47 = vmul.f32 %v461_v46, %v447_v41  ;;  %v1399_v50 = vmul.f32 %v461_v46, %v445_v44  ;;  %v1401_v51 = vmul.f32 %v461_v46, %v443_v45  ;;  %v1408_v25 = vmul.f32 %v461_v46, %v448_v52  ;;  %1032 = vset.pattern.permute.xlu2 %v1084_v40 }
 0x2f1   :  { %v1414_v60 = vmul.f32 %v461_v46, %v446_v56  ;;  %v1416_v33 = vmul.f32 %v461_v46, %v444_v23  ;;  %v1425_v2 = vmul.f32 %v461_v46, %v450_v22  ;;  %v1428_v4 = vmul.f32 %v461_v46, %v449_v63 }
 0x2f2   :  { %v478_v31 = vmul.f32 %v1041_v42, %v1397_v47  ;;  %v476_v53 = vmul.f32 %v1041_v42, %v1399_v50  ;;  %v474_v54 = vmul.f32 %v1041_v42, %v1401_v51  ;;  %v479_v61 = vmul.f32 %v1041_v42, %v1408_v25 }
 0x2f3   :  { %v477_v27 = vmul.f32 %v1041_v42, %v1414_v60  ;;  %v475_v62 = vmul.f32 %v1041_v42, %v1416_v33  ;;  %v481_v6 = vmul.f32 %v1041_v42, %v1425_v2  ;;  %v480_v55 = vmul.f32 %v1041_v42, %v1428_v4 }
 0x2f4   :  { %v494_v57 = vsel %vm126_vm1, %v478_v31, 0.0  ;;  %v488_v58 = vsel %vm126_vm1, %v476_v53, 0.0  ;;  %v482_v59 = vsel %vm126_vm1, %v474_v54, 0.0  ;;  %v497_v0 = vsel %vm126_vm1, %v479_v61, 0.0 }
 0x2f5   :  { %495 = vadd.xlane.f32.xlu2 %v494_v57  ;;  %489 = vadd.xlane.f32.xlu1 %v488_v58  ;;  %v491_v1 = vsel %vm126_vm1, %v477_v27, 0.0  ;;  %v485_v3 = vsel %vm126_vm1, %v475_v62, 0.0  ;;  %v503_v5 = vsel %vm126_vm1, %v481_v6, 0.0  ;;  %v500_v49 = vsel %vm126_vm1, %v480_v55, 0.0 }
 0x2f6   :  { %483 = vadd.xlane.f32.xlu0 %v482_v59 }
 0x2fd   :  { %498 = vadd.xlane.f32.xlu2 %v497_v0  ;;  %492 = vadd.xlane.f32.xlu1 %v491_v1 }
 0x2fe   :  { %486 = vadd.xlane.f32.xlu0 %v485_v3 }
 0x305   :  { %504 = vadd.xlane.f32.xlu1 %v503_v5 }
 0x306   :  { %501 = vadd.xlane.f32.xlu0 %v500_v49 }
 0x31a   :  { %562 = vperm.xlu0 %1030, %v1441_v34  }
 0x31e   :  { %568 = vperm.xlu1 %1031, %v1441_v34  }
 0x322   :  { %1034 = vset.pattern.permute.xlu0 %v1084_v40 }
 0x326   :  { %1033 = vset.pattern.permute.xlu1 %v1084_v40 }
 0x368   :  { %v1445_v35 = vpop.xlane.xlu2 %495  ;;  %v1447_v8 = vpop.xlane.xlu1 %489 }
 0x369   :  { %v1449_v9 = vpop.xlane.xlu0 %483  ;;  %v521_v37 = vperm.slane %v1447_v8, %v1441_v34  ;;  %v524_v19 = vperm.slane %v1445_v35, %v1441_v34 }
 0x36a   :  { %v516_v39 = vperm.slane %v1449_v9, %v1441_v34 }
 0x370   :  { %v1454_v11 = vpop.xlane.xlu1 %492  ;;  %v1458_v16 = vpop.xlane.xlu2 %498 }
 0x371   :  { %v1456_v15 = vpop.xlane.xlu0 %486  ;;  %v522_v17 = vperm.slane %v1454_v11, %v1452_v10  ;;  %v525_v43 = vperm.slane %v1458_v16, %v1452_v10  ;;  %1048 = vtanh.f32 %v1454_v11 }
 0x372   :  { %v518_v18 = vperm.slane %v1456_v15, %v1452_v10  ;;  %1050 = vtanh.f32 %v1456_v15 }
 0x373   :  { %v523_v13 = vsel %vm519_vm8, %v522_v17, %v521_v37  ;;  %v526_v26 = vsel %vm519_vm8, %v525_v43, %v524_v19  ;;  %1052 = vtanh.f32 %v1447_v8 }
 0x374   :  { %v520_v14 = vsel %vm519_vm8, %v518_v18, %v516_v39  ;;  %1054 = vtanh.f32 %v1449_v9 }
 0x375   :  { %v531_v28 = vsel %vm530_vm9, %v523_v13, %v520_v14  ;;  %1056 = vtanh.f32 %v1458_v16 }
 0x376   :  { %v533_v32 = vsel %vm532_vm10, %v526_v26, %v531_v28 }
 0x378   :  { %v1474_v20 = vpop.xlane.xlu1 %504 }
 0x379   :  { %v528_v21 = vperm.slane %v1474_v20, %v1452_v10  ;;  %v1478_v24 = vpop.xlane.xlu0 %501  ;;  %1058 = vtanh.f32 %v1474_v20 }
 0x37a   :  { %v527_v29 = vperm.slane %v1478_v24, %v1441_v34  ;;  %1060 = vtanh.f32 %v1478_v24 }
 0x37b   :  { %1062 = vtanh.f32 %v1445_v35 }
 0x37c   :  { %v529_v30 = vsel %vm519_vm8, %v528_v21, %v527_v29 }
 0x37d   :  { %v1487_v36 = vsel %vm534_vm11, %v529_v30, %v533_v32 }
 0x37e   :  { %v538_v38 = vsel %vm537_vm12, %v1487_v36, -inf }
 0x37f   :  { %539 = vmax.xlane.f32.xlu2 %v538_v38 }
 0x38c   :  { %v563_v44 = vpop.permute.xlu0 %562 }
 0x390   :  { %v569_v42 = vpop.permute.xlu1 %568 }
 0x3f2   :  { %v540_v41 = vpop.xlane.xlu2 %539 }
 0x3f3   :  { %v544_v45 = vperm.slane %v540_v41, 2  ;;  %v543_v46 = vperm.slane %v540_v41, 1  ;;  %v542_v52 = vperm.slane %v540_v41, 0  ;;  %v545_v57 = vperm.slane %v540_v41, 3 }
 0x3f5   :  { %vm555_vm13 = vcmp.eq.f32.partialorder %v1458_v16, %v544_v45  ;;  %vm552_vm14 = vcmp.eq.f32.partialorder %v1447_v8, %v543_v46  ;;  %vm550_vm15 = vcmp.eq.f32.partialorder %v1449_v9, %v542_v52  ;;  %vm554_vm0 = vcmp.eq.f32.partialorder %v1445_v35, %v544_v45 }
 0x3f6   :  { %v575_v31 = vsel %vm555_vm13, %v569_v42, 16  ;;  %v572_v53 = vsel %vm552_vm14, %v563_v44, 16  ;;  %v570_v54 = vsel %vm550_vm15, %v563_v44, 16  ;;  %vm551_vm2 = vcmp.eq.f32.partialorder %v1456_v15, %v542_v52 }
 0x3f7   :  { %594 = vperm.xlu0 %1034, %v575_v31   ;;  %585 = vperm.xlu1 %1033, %v572_v53   ;;  %v574_v56 = vsel %vm554_vm0, %v563_v44, 16  ;;  %v571_v23 = vsel %vm551_vm2, %v569_v42, 16  ;;  %vm557_vm3 = vcmp.eq.f32.partialorder %v1474_v20, %v545_v57  ;;  %vm553_vm4 = vcmp.eq.f32.partialorder %v1454_v11, %v543_v46 }
 0x3f8   :  { %579 = vperm.xlu2 %1032, %v570_v54   ;;  %v577_v58 = vsel %vm557_vm3, %v569_v42, 16  ;;  %v573_v59 = vsel %vm553_vm4, %v569_v42, 16  ;;  %vm556_vm5 = vcmp.eq.f32.partialorder %v1478_v24, %v545_v57  ;;  %vm636_vm15 = vcmp.eq.s32.totalorder %v1441_v34, 0 }
 0x3f9   :  { %v576_v61 = vsel %vm556_vm5, %v563_v44, 16  ;;  %vm663_vm0 = vcmp.eq.s32.totalorder %v1441_v34, 1  ;;  %vm690_vm5 = vcmp.eq.s32.totalorder %v1441_v34, 2 }
 0x3ff   :  { %591 = vperm.xlu1 %1033, %v574_v56   ;;  %1036 = vset.pattern.permute.xlu0 %v1438_v12 }
 0x400   :  { %582 = vperm.xlu2 %1032, %v571_v23  }
 0x407   :  { %600 = vperm.xlu1 %1033, %v577_v58  }
 0x408   :  { %588 = vperm.xlu2 %1032, %v573_v59  }
 0x40f   :  { %1037 = vset.pattern.permute.xlu1 %v1434_v48 }
 0x410   :  { %597 = vperm.xlu2 %1032, %v576_v61  }
 0x418   :  { %1035 = vset.pattern.permute.xlu2 %v1434_v48 }
 0x452   :  { %v580_v27 = vpop.permute.xlu2 %579 }
 0x453   :  { %v602_v17 = vperm.slane %v580_v27, %v1441_v34 }
 0x45a   :  { %v583_v62 = vpop.permute.xlu2 %582 }
 0x45b   :  { %v603_v55 = vperm.slane %v583_v62, %v1452_v10 }
 0x45d   :  { %v604_v39 = vsel %vm519_vm8, %v603_v55, %v602_v17  ;;  %v1085_v55 = vmov 0.0  }
 0x462   :  { %v589_v63 = vpop.permute.xlu2 %588 }
 0x463   :  { %v606_v5 = vperm.slane %v589_v63, %v1452_v10 }
 0x469   :  { %v586_v22 = vpop.permute.xlu1 %585  ;;  %v595_v3 = vpop.permute.xlu0 %594 }
 0x46a   :  { %v605_v1 = vperm.slane %v586_v22, %v1441_v34  ;;  %v598_v49 = vpop.permute.xlu2 %597  ;;  %v609_v7 = vperm.slane %v595_v3, %v1452_v10 }
 0x46b   :  { %v611_v43 = vperm.slane %v598_v49, %v1441_v34 }
 0x46c   :  { %v607_v48 = vsel %vm519_vm8, %v606_v5, %v605_v1 }
 0x46d   :  { %v614_v14 = vsel %vm530_vm9, %v607_v48, %v604_v39 }
 0x471   :  { %v592_v0 = vpop.permute.xlu1 %591 }
 0x472   :  { %v608_v6 = vperm.slane %v592_v0, %v1441_v34 }
 0x474   :  { %v610_v18 = vsel %vm519_vm8, %v609_v7, %v608_v6 }
 0x475   :  { %v615_v21 = vsel %vm532_vm10, %v610_v18, %v614_v14 }
 0x479   :  { %v601_v37 = vpop.permute.xlu1 %600 }
 0x47a   :  { %v612_v13 = vperm.slane %v601_v37, %v1452_v10 }
 0x47c   :  { %v613_v19 = vsel %vm519_vm8, %v612_v13, %v611_v43 }
 0x47d   :  { %v616_v26 = vsel %vm534_vm11, %v613_v19, %v615_v21 }
 0x47e   :  { %v617_v28 = vsel %vm537_vm12, %v616_v26, 2147483647 }
 0x47f   :  { %v619_v29 = vshra.s32 %v617_v28, 16  ;;  %v618_v32 = vand.u32 65535, %v617_v28 }
 0x481   :  { %v621_v30 = vcvt.s32.f32 %v619_v29  ;;  %v620_v40 = vcvt.s32.f32 %v618_v32 }
 0x483   :  { %622 = vmin.xlane.f32.xlu2 %v621_v30 }
 0x4f6   :  { %v623_v38 = vpop.xlane.xlu2 %622 }
 0x4f7   :  { %vm624_vm6 = vcmp.eq.f32.partialorder %v621_v30, %v623_v38  ;;  %v629_v42 = vcvt.f32.s32 %v623_v38 }
 0x4f8   :  { %v625_v41 = vsel %vm624_vm6, %v620_v40, inf }
 0x4f9   :  { %626 = vmin.xlane.f32.xlu1 %v625_v41  ;;  %v630_v45 = vshll.u32 %v629_v42, 16 }
 0x56c   :  { %v627_v44 = vpop.xlane.xlu1 %626 }
 0x56d   :  { %v628_v46 = vcvt.f32.s32 %v627_v44 }
 0x56f   :  { %v631_v52 = vadd.s32 %v630_v45, %v628_v46 }
 0x571   :  { %vm632_vm7 = vcmp.eq.s32.totalorder %v1441_v34, %v631_v52  ;;  %v637_v3 = vsel %vm636_vm15, %v631_v52, 0 }
 0x572   :  { %v638_v31 = vsel %vm632_vm7, -inf, %v1487_v36  ;;  %v1019_v5 = vsel %vm632_vm7, 1.0, %v1085_v55 }
 0x573   :  { %v639_v53 = vsel %vm537_vm12, %v638_v31, -inf }
 0x574   :  { %640 = vmax.xlane.f32.xlu0 %v639_v53 }
 0x5e7   :  { %v641_v54 = vpop.xlane.xlu0 %640 }
 0x5e8   :  { %vm642_vm13 = vcmp.eq.f32.partialorder %v638_v31, %v641_v54 }
 0x5e9   :  { %v643_v56 = vsel %vm642_vm13, %v1441_v34, 16 }
 0x5ea   :  { %v644_v23 = vsel %vm537_vm12, %v643_v56, 2147483647 }
 0x5eb   :  { %v646_v57 = vshra.s32 %v644_v23, 16  ;;  %v645_v59 = vand.u32 65535, %v644_v23 }
 0x5ed   :  { %v648_v58 = vcvt.s32.f32 %v646_v57  ;;  %v647_v27 = vcvt.s32.f32 %v645_v59  ;;  %v1049_v59 = vpop.eup %1048 }
 0x5ee   :  { %v741_v11 = vperm.slane %v1049_v59, %v1452_v10 }
 0x5ef   :  { %649 = vmin.xlane.f32.xlu2 %v648_v58 }
 0x662   :  { %v650_v61 = vpop.xlane.xlu2 %649 }
 0x663   :  { %vm651_vm14 = vcmp.eq.f32.partialorder %v648_v58, %v650_v61  ;;  %v656_v22 = vcvt.f32.s32 %v650_v61  ;;  %v1051_v61 = vpop.eup %1050 }
 0x664   :  { %v652_v62 = vsel %vm651_vm14, %v647_v27, inf  ;;  %v1053_v27 = vpop.eup %1052  ;;  %v738_v15 = vperm.slane %v1051_v61, %v1452_v10  ;;  %vm719_vm14 = vcmask 27648  }
 0x665   :  { %653 = vmin.xlane.f32.xlu1 %v652_v62  ;;  %v657_v63 = vshll.u32 %v656_v22, 16  ;;  %v1055_v62 = vpop.eup %1054  ;;  %v740_v16 = vperm.slane %v1053_v27, %v1441_v34 }
 0x666   :  { %v1057_v22 = vpop.eup %1056  ;;  %v737_v20 = vperm.slane %v1055_v62, %v1441_v34 }
 0x667   :  { %v1059_v8 = vpop.eup %1058  ;;  %v744_v24 = vperm.slane %v1057_v22, %v1452_v10 }
 0x668   :  { %v1061_v9 = vpop.eup %1060  ;;  %v739_v35 = vsel %vm519_vm8, %v738_v15, %v737_v20 }
 0x6d8   :  { %v654_v36 = vpop.xlane.xlu1 %653 }
 0x6d9   :  { %v655_v0 = vcvt.f32.s32 %v654_v36 }
 0x6db   :  { %v658_v1 = vadd.s32 %v657_v63, %v655_v0  ;;  %v1063_v63 = vpop.eup %1062  ;;  %v742_v0 = vsel %vm519_vm8, %v741_v11, %v740_v16 }
 0x6dd   :  { %v664_v6 = vsel %vm663_vm0, %v658_v1, %v637_v3  ;;  %vm659_vm2 = vcmp.eq.s32.totalorder %v1441_v34, %v658_v1  ;;  %v747_v3 = vperm.slane %v1059_v8, %v1452_v10 }
 0x6de   :  { %v665_v49 = vsel %vm659_vm2, -inf, %v638_v31  ;;  %v1020_v7 = vsel %vm659_vm2, 1.0, %v1085_v55 }
 0x6df   :  { %v666_v17 = vsel %vm537_vm12, %v665_v49, -inf  ;;  %v662_v48 = vadd.f32 %v1020_v7, %v1019_v5  ;;  %v743_v7 = vperm.slane %v1063_v63, %v1441_v34 }
 0x6e0   :  { %667 = vmax.xlane.f32.xlu2 %v666_v17 }
 0x753   :  { %v668_v18 = vpop.xlane.xlu2 %667 }
 0x754   :  { %vm669_vm3 = vcmp.eq.f32.partialorder %v665_v49, %v668_v18  ;;  %v749_v18 = vsel %vm530_vm9, %v742_v0, %v739_v35 }
 0x755   :  { %v670_v37 = vsel %vm669_vm3, %v1441_v34, 16 }
 0x756   :  { %v671_v39 = vsel %vm537_vm12, %v670_v37, 2147483647 }
 0x757   :  { %v673_v43 = vshra.s32 %v671_v39, 16  ;;  %v672_v14 = vand.u32 65535, %v671_v39 }
 0x759   :  { %v675_v13 = vcvt.s32.f32 %v673_v43  ;;  %v674_v21 = vcvt.s32.f32 %v672_v14 }
 0x75b   :  { %676 = vmin.xlane.f32.xlu0 %v675_v13 }
 0x7ce   :  { %v677_v19 = vpop.xlane.xlu0 %676 }
 0x7cf   :  { %vm678_vm4 = vcmp.eq.f32.partialorder %v675_v13, %v677_v19  ;;  %v683_v28 = vcvt.f32.s32 %v677_v19 }
 0x7d0   :  { %v679_v26 = vsel %vm678_vm4, %v674_v21, inf }
 0x7d1   :  { %680 = vmin.xlane.f32.xlu1 %v679_v26  ;;  %v684_v30 = vshll.u32 %v683_v28, 16 }
 0x844   :  { %v681_v29 = vpop.xlane.xlu1 %680 }
 0x845   :  { %v682_v32 = vcvt.f32.s32 %v681_v29 }
 0x847   :  { %v685_v38 = vadd.s32 %v684_v30, %v682_v32 }
 0x849   :  { %v691_v40 = vsel %vm690_vm5, %v685_v38, %v664_v6  ;;  %vm686_vm6 = vcmp.eq.s32.totalorder %v1441_v34, %v685_v38  ;;  %v746_v6 = vperm.slane %v1061_v9, %v1441_v34 }
 0x84a   :  { %v692_v41 = vsel %vm686_vm6, -inf, %v665_v49  ;;  %v1021_v42 = vsel %vm686_vm6, 1.0, %v1085_v55 }
 0x84b   :  { %v693_v44 = vsel %vm537_vm12, %v692_v41, -inf  ;;  %v689_v45 = vadd.f32 %v1021_v42, %v662_v48  ;;  %v745_v48 = vsel %vm519_vm8, %v744_v24, %v743_v7  ;;  %v748_v37 = vsel %vm519_vm8, %v747_v3, %v746_v6 }
 0x84c   :  { %694 = vmax.xlane.f32.xlu2 %v693_v44  ;;  %v750_v43 = vsel %vm532_vm10, %v745_v48, %v749_v18 }
 0x84d   :  { %v751_v14 = vsel %vm534_vm11, %v748_v37, %v750_v43 }
 0x8bf   :  { %v695_v46 = vpop.xlane.xlu2 %694 }
 0x8c0   :  { %vm696_vm7 = vcmp.eq.f32.partialorder %v692_v41, %v695_v46 }
 0x8c1   :  { %v697_v52 = vsel %vm696_vm7, %v1441_v34, 16 }
 0x8c2   :  { %v698_v31 = vsel %vm537_vm12, %v697_v52, 2147483647  ;;  %vm717_vm12 = vcmp.eq.s32.totalorder %v1441_v34, 3 }
 0x8c3   :  { %v700_v53 = vshra.s32 %v698_v31, 16  ;;  %v699_v56 = vand.u32 65535, %v698_v31 }
 0x8c5   :  { %v702_v54 = vcvt.s32.f32 %v700_v53  ;;  %v701_v57 = vcvt.s32.f32 %v699_v56 }
 0x8c7   :  { %703 = vmin.xlane.f32.xlu0 %v702_v54 }
 0x93a   :  { %v704_v23 = vpop.xlane.xlu0 %703 }
 0x93b   :  { %vm705_vm13 = vcmp.eq.f32.partialorder %v702_v54, %v704_v23  ;;  %v710_v36 = vcvt.f32.s32 %v704_v23 }
 0x93c   :  { %v706_v58 = vsel %vm705_vm13, %v701_v57, inf }
 0x93d   :  { %707 = vmin.xlane.f32.xlu1 %v706_v58  ;;  %v711_v5 = vshll.u32 %v710_v36, 16 }
 0x9b0   :  { %v708_v1 = vpop.xlane.xlu1 %707 }
 0x9b1   :  { %v709_v49 = vcvt.f32.s32 %v708_v1 }
 0x9b3   :  { %v712_v17 = vadd.s32 %v711_v5, %v709_v49 }
 0x9b5   :  { %vm713_vm15 = vcmp.eq.s32.totalorder %v1441_v34, %v712_v17  ;;  %v718_v39 = vsel %vm717_vm12, %v712_v17, %v691_v40 }
 0x9b6   :  { %v1022_v10 = vsel %vm713_vm15, 1.0, %v1085_v55  ;;  %720 = vst.msk [vmem:[%s1618_s10] sm:$0xf] %vm719_vm14, %v718_v39 }
 0x9b7   :  { %v716_v13 = vadd.f32 %v1022_v10, %v689_v45 }
 0x9b9   :  { %v753_v19 = vmul.f32 %v751_v14, %v716_v13 }
 0x9bb   :  { %v780_v21 = vperm.slane %v753_v19, 2  ;;  %v767_v26 = vperm.slane %v753_v19, 1  ;;  %v754_v28 = vperm.slane %v753_v19, 0  ;;  %v793_v34 = vperm.slane %v753_v19, 3 }
 0x9bd   :  { %785 = vperm.xlu1 %1037, %v780_v21   ;;  %778 = vperm.xlu0 %1036, %v767_v26  }
 0x9be   :  { %772 = vperm.xlu2 %1035, %v767_v26  }
 0x9c5   :  { %759 = vperm.xlu1 %1037, %v754_v28  }
 0x9c6   :  { %1038 = vset.pattern.permute.xlu2 %v1438_v12 }
 0x9cd   :  { %798 = vperm.xlu1 %1037, %v793_v34  }
 0x9ce   :  { %791 = vperm.xlu2 %1038, %v780_v21  }
 0x9d6   :  { %765 = vperm.xlu2 %1038, %v754_v28  }
 0x9de   :  { %804 = vperm.xlu2 %1038, %v793_v34  }
 0xa18   :  { %v773_v55 = vpop.permute.xlu2 %772 }
 0xa19   :  { %v808_v30 = vmul.f32 %v773_v55, %v1399_v50 }
 0xa1b   :  { %v823_v12 = vsel %vm126_vm1, %v808_v30, 0.0 }
 0xa28   :  { %v792_v29 = vpop.permute.xlu2 %791 }
 0xa29   :  { %v811_v32 = vmul.f32 %v792_v29, %v1408_v25 }
 0xa2b   :  { %v833_v45 = vsel %vm126_vm1, %v811_v32, 0.0 }
 0xa2f   :  { %v786_v38 = vpop.permute.xlu1 %785  ;;  %v779_v40 = vpop.permute.xlu0 %778 }
 0xa30   :  { %v810_v41 = vmul.f32 %v786_v38, %v1397_v47  ;;  %v809_v42 = vmul.f32 %v779_v40, %v1414_v60  ;;  %v766_v44 = vpop.permute.xlu2 %765  ;;  %v16_v40 = vstv %s1620_s8 }
 0xa31   :  { %v807_v25 = vmul.f32 %v766_v44, %v1416_v33  ;;  %17 = vst [vmem:[#allocation2] sm:$0x1] %v16_v40 }
 0xa32   :  { %v832_v46 = vsel %vm126_vm1, %v810_v41, 0.0  ;;  %v824_v52 = vsel %vm126_vm1, %v809_v42, 0.0 }
 0xa33   :  { %v834_v31 = vadd.f32 %v833_v45, %v832_v46  ;;  %v825_v53 = vadd.f32 %v824_v52, %v823_v12  ;;  %v815_v59 = vsel %vm126_vm1, %v807_v25, 0.0 }
 0xa35   :  { %v835_v50 = vrot.slane %v834_v31, 4  ;;  %v826_v54 = vrot.slane %v825_v53, 4 }
 0xa37   :  { %v836_v56 = vadd.f32 %v835_v50, %v834_v31  ;;  %v827_v23 = vadd.f32 %v826_v54, %v825_v53  ;;  %v760_v47 = vpop.permute.xlu1 %759 }
 0xa38   :  { %v806_v60 = vmul.f32 %v760_v47, %v1401_v51  ;;  %v805_v22 = vpop.permute.xlu2 %804 }
 0xa39   :  { %v837_v57 = vrot.slane %v836_v56, 2  ;;  %v828_v58 = vrot.slane %v827_v23, 2  ;;  %v813_v33 = vmul.f32 %v805_v22, %v1425_v2 }
 0xa3a   :  { %v814_v61 = vsel %vm126_vm1, %v806_v60, 0.0 }
 0xa3b   :  { %v838_v27 = vadd.f32 %v837_v57, %v836_v56  ;;  %v829_v62 = vadd.f32 %v828_v58, %v827_v23  ;;  %v816_v11 = vadd.f32 %v815_v59, %v814_v61  ;;  %v842_v1 = vsel %vm126_vm1, %v813_v33, 0.0 }
 0xa3d   :  { %v839_v15 = vrot.slane %v838_v27, 1  ;;  %v830_v8 = vrot.slane %v829_v62, 1  ;;  %v817_v36 = vrot.slane %v816_v11, 4 }
 0xa3f   :  { %v840_v9 = vadd.f32 %v839_v15, %v838_v27  ;;  %v831_v16 = vadd.f32 %v830_v8, %v829_v62  ;;  %v818_v20 = vadd.f32 %v817_v36, %v816_v11  ;;  %v799_v63 = vpop.permute.xlu1 %798 }
 0xa40   :  { %v812_v51 = vmul.f32 %v799_v63, %v1428_v4 }
 0xa41   :  { %v1025_v24 = vmul.f32 -0.25, %v840_v9  ;;  %v1024_v0 = vmul.f32 -0.25, %v831_v16  ;;  %v819_v35 = vrot.slane %v818_v20, 2  ;;  %v1042_v9 = vld [vmem:[%s1619_s7] ss:$0 sm:$0xff] }
 0xa42   :  { %v841_v3 = vsel %vm126_vm1, %v812_v51, 0.0 }
 0xa43   :  { %v862_v6 = vmul.f32 1.442695, %v1025_v24  ;;  %v860_v5 = vmul.f32 1.442695, %v1024_v0  ;;  %v820_v49 = vadd.f32 %v819_v35, %v818_v20  ;;  %v843_v7 = vadd.f32 %v842_v1, %v841_v3 }
 0xa45   :  { %1064 = vpow2.f32 %v862_v6  ;;  %v821_v17 = vrot.slane %v820_v49, 1  ;;  %v844_v2 = vrot.slane %v843_v7, 4 }
 0xa46   :  { %1066 = vpow2.f32 %v860_v5 }
 0xa47   :  { %v822_v48 = vadd.f32 %v821_v17, %v820_v49  ;;  %v845_v18 = vadd.f32 %v844_v2, %v843_v7 }
 0xa49   :  { %v1023_v37 = vmul.f32 -0.25, %v822_v48  ;;  %v846_v39 = vrot.slane %v845_v18, 2 }
 0xa4b   :  { %v1065_v4 = vpop.eup %1064  ;;  %v858_v10 = vmul.f32 1.442695, %v1023_v37  ;;  %v847_v43 = vadd.f32 %v846_v39, %v845_v18 }
 0xa4c   :  { %v1067_v13 = vpop.eup %1066  ;;  %v868_v14 = vadd.f32 1.0, %v1065_v4 }
 0xa4d   :  { %v867_v19 = vadd.f32 1.0, %v1067_v13  ;;  %1068 = vpow2.f32 %v858_v10  ;;  %v848_v21 = vrot.slane %v847_v43, 1 }
 0xa4e   :  { %1070 = vrcp.f32 %v868_v14  ;;  %vm905_vm4 = vweird.f32 %v868_v14  ;;  %v909_v58 = vand.u32 2147483647, %v868_v14  ;;  %v911_v59 = vand.u32 2147483648, %v868_v14 }
 0xa4f   :  { %1072 = vrcp.f32 %v867_v19  ;;  %v849_v26 = vadd.f32 %v848_v21, %v847_v43  ;;  %vm890_vm8 = vweird.f32 %v867_v19  ;;  %v896_v25 = vand.u32 2147483648, %v867_v19 }
 0xa50   :  { %v894_v23 = vand.u32 2147483647, %v867_v19  ;;  %v912_v63 = vor.u32 1.1754944e-38, %v911_v59  ;;  %vm910_vm14 = vcmp.eq.f32.partialorder %v909_v58, 8.507059e+37 }
 0xa51   :  { %v1026_v28 = vmul.f32 -0.25, %v849_v26  ;;  %v897_v15 = vor.u32 1.1754944e-38, %v896_v25 }
 0xa52   :  { %vm895_vm13 = vcmp.eq.f32.partialorder %v894_v23, 8.507059e+37 }
 0xa53   :  { %v1069_v34 = vpop.eup %1068  ;;  %v864_v55 = vmul.f32 1.442695, %v1026_v28 }
 0xa54   :  { %v1071_v29 = vpop.eup %1070  ;;  %v866_v30 = vadd.f32 1.0, %v1069_v34 }
 0xa55   :  { %v1073_v32 = vpop.eup %1072  ;;  %1074 = vpow2.f32 %v864_v55  ;;  %v901_v38 = vmul.f32 %v1071_v29, %v868_v14  ;;  %vm906_vm0 = vweird.f32 %v1071_v29 }
 0xa56   :  { %1076 = vrcp.f32 %v866_v30  ;;  %v886_v41 = vmul.f32 %v1073_v32, %v867_v19  ;;  %vm891_vm1 = vweird.f32 %v1073_v32  ;;  %v881_v60 = vand.u32 2147483648, %v866_v30  ;;  %vm1596_vm6 = vmor %vm905_vm4, %vm906_vm0  ;;  %v1043_v19 = vld [vmem:[#allocation2] ss:$0 sm:$0xff] }
 0xa57   :  { %v902_v44 = vsub.f32 1.0, %v901_v38  ;;  %vm1590_vm3 = vmor %vm890_vm8, %vm891_vm1  ;;  %vm875_vm5 = vweird.f32 %v866_v30  ;;  %v879_v27 = vand.u32 2147483647, %v866_v30 }
 0xa58   :  { %v887_v42 = vsub.f32 1.0, %v886_v41  ;;  %v882_v16 = vor.u32 1.1754944e-38, %v881_v60 }
 0xa59   :  { %v903_v53 = vmul.f32 %v1071_v29, %v902_v44  ;;  %vm880_vm12 = vcmp.eq.f32.partialorder %v879_v27, 8.507059e+37 }
 0xa5a   :  { %v888_v45 = vmul.f32 %v1073_v32, %v887_v42 }
 0xa5b   :  { %v1075_v12 = vpop.eup %1074  ;;  %v904_v47 = vadd.f32 %v1071_v29, %v903_v53 }
 0xa5c   :  { %v1077_v46 = vpop.eup %1076  ;;  %v869_v52 = vadd.f32 1.0, %v1075_v12  ;;  %v889_v54 = vadd.f32 %v1073_v32, %v888_v45 }
 0xa5d   :  { %v871_v31 = vmul.f32 %v1077_v46, %v866_v30  ;;  %vm876_vm2 = vweird.f32 %v1077_v46  ;;  %v908_v36 = vsel %vm1596_vm6, %v1071_v29, %v904_v47 }
 0xa5e   :  { %1078 = vrcp.f32 %v869_v52  ;;  %v893_v62 = vsel %vm1590_vm3, %v1073_v32, %v889_v54  ;;  %vm877_vm7 = vmor %vm875_vm5, %vm876_vm2  ;;  %v913_v0 = vsel %vm910_vm14, %v912_v63, %v908_v36  ;;  %v926_v35 = vand.u32 2147483648, %v869_v52 }
 0xa5f   :  { %v872_v50 = vsub.f32 1.0, %v871_v31  ;;  %v898_v20 = vsel %vm895_vm13, %v897_v15, %v893_v62  ;;  %v924_v3 = vand.u32 2147483647, %v869_v52  ;;  %vm920_vm1 = vweird.f32 %v869_v52 }
 0xa60   :  { %v935_v6 = vmul.f32 %v1042_v9, %v898_v20  ;;  %v927_v7 = vor.u32 1.1754944e-38, %v926_v35  ;;  %v936_v17 = vmul.f32 %v1042_v9, %v913_v0  ;;  %vm949_vm2 = vcmask 257024  }
 0xa61   :  { %v873_v56 = vmul.f32 %v1077_v46, %v872_v50  ;;  %vm925_vm0 = vcmp.eq.f32.partialorder %v924_v3, 8.507059e+37 }
 0xa62   :  { %v942_v48 = vrot.slane %v935_v6, 7  ;;  %v944_v4 = vrot.slane %v936_v17, 6 }
 0xa63   :  { %v874_v61 = vadd.f32 %v1077_v46, %v873_v56 }
 0xa64   :  { %v1079_v11 = vpop.eup %1078 }
 0xa65   :  { %v878_v8 = vsel %vm877_vm7, %v1077_v46, %v874_v61  ;;  %v916_v33 = vmul.f32 %v1079_v11, %v869_v52  ;;  %vm921_vm15 = vweird.f32 %v1079_v11 }
 0xa66   :  { %v883_v24 = vsel %vm880_vm12, %v882_v16, %v878_v8  ;;  %vm922_vm8 = vmor %vm920_vm1, %vm921_vm15 }
 0xa67   :  { %v917_v51 = vsub.f32 1.0, %v916_v33  ;;  %v934_v49 = vmul.f32 %v1042_v9, %v883_v24 }
 0xa69   :  { %v918_v1 = vmul.f32 %v1079_v11, %v917_v51  ;;  %v943_v39 = vsel %vm530_vm9, %v942_v48, %v934_v49 }
 0xa6a   :  { %v945_v43 = vsel %vm532_vm10, %v944_v4, %v943_v39 }
 0xa6b   :  { %v919_v5 = vadd.f32 %v1079_v11, %v918_v1 }
 0xa6d   :  { %v923_v2 = vsel %vm922_vm8, %v1079_v11, %v919_v5 }
 0xa6e   :  { %v928_v18 = vsel %vm925_vm0, %v927_v7, %v923_v2 }
 0xa6f   :  { %v937_v37 = vmul.f32 %v1042_v9, %v928_v18 }
 0xa71   :  { %v946_v10 = vrot.slane %v937_v37, 5 }
 0xa73   :  { %v947_v13 = vsel %vm534_vm11, %v946_v10, %v945_v43  ;;  %vm977_vm11 = vcmask 3072  }
 0xa74   :  { %v950_v14 = vsel %vm949_vm2, %v947_v13, 0.0 }
 0xa75   :  { %951 = vadd.xlane.f32.xlu0 %v950_v14 }
 0xae8   :  { %v952_v21 = vpop.xlane.xlu0 %951 }
 0xae9   :  { %v957_v26 = vadd.f32 %v1043_v19, %v952_v21 }
 0xaeb   :  { %v1027_v28 = vmul.f32 -1.442695, %v957_v26 }
 0xaed   :  { %1080 = vpow2.f32 %v1027_v28 }
 0xaf3   :  { %v1081_v34 = vpop.eup %1080 }
 0xaf4   :  { %v961_v55 = vadd.f32 1.0, %v1081_v34 }
 0xaf6   :  { %1082 = vrcp.f32 %v961_v55  ;;  %v973_v38 = vand.u32 2147483648, %v961_v55  ;;  %v971_v41 = vand.u32 2147483647, %v961_v55  ;;  %vm967_vm10 = vweird.f32 %v961_v55 }
 0xaf8   :  { %v974_v44 = vor.u32 1.1754944e-38, %v973_v38  ;;  %vm972_vm4 = vcmp.eq.f32.partialorder %v971_v41, 8.507059e+37 }
 0xafc   :  { %v1083_v29 = vpop.eup %1082 }
 0xafd   :  { %v963_v30 = vmul.f32 %v1083_v29, %v961_v55  ;;  %vm968_vm9 = vweird.f32 %v1083_v29 }
 0xafe   :  { %vm969_vm3 = vmor %vm967_vm10, %vm968_vm9 }
 0xaff   :  { %v964_v32 = vsub.f32 1.0, %v963_v30 }
 0xb01   :  { %v965_v40 = vmul.f32 %v1083_v29, %v964_v32 }
 0xb03   :  { %v966_v42 = vadd.f32 %v1083_v29, %v965_v40 }
 0xb05   :  { %v970_v12 = vsel %vm969_vm3, %v1083_v29, %v966_v42 }
 0xb06   :  { %v975_v45 = vsel %vm972_vm4, %v974_v44, %v970_v12 }
 0xb07   :  { %978 = vst.msk [vmem:[%s1621_s9] sm:$0xf] %vm977_vm11, %v975_v45 }

</bundles_post_ra>
